<compile_context>
chip_gen: v7x
topology: tpu7x:2x2x1
jax: 0.10.0
libtpu: 0.0.40
codegen_flags: <defaults>
</compile_context>

<pallas_src>
import functools
import math

import jax
import jax.numpy as jnp
from jax.experimental import pallas as pl
from jax.experimental.pallas import tpu as pltpu


def _bottleneck_kernel(x_ref, w1_ref, b1_ref, w2_ref, b2_ref, w3_ref, b3_ref,
                       o_ref, *, H, WT, P, C):
    """One (batch, W-tile) block, channels-last.

    x_ref : (1, H, WT, C) f32   input tile
    w1_ref: (C, P)        bf16  conv1 weight (BN1 folded)
    b1_ref: (1, P)        f32   folded BN1 bias
    w2_ref: (P, 3*P)      bf16  conv2 weights, the 3 H-taps concatenated on cout
    b2_ref: (1, P)        f32   folded BN2 bias
    w3_ref: (P, C)        bf16  conv3 weight (BN3 folded)
    b3_ref: (1, C)        f32   folded BN3 bias
    o_ref : (1, H, WT, C) f32   output tile
    """
    n = H * WT

    # conv1 (1x1) + bn1 + relu: one bf16 MXU matmul over channels, f32 accumulate.
    xm = x_ref[0].reshape(n, C).astype(jnp.bfloat16)
    y1 = jnp.dot(xm, w1_ref[...], preferred_element_type=jnp.float32) + b1_ref[...]
    y1 = jnp.maximum(y1, 0.0).astype(jnp.bfloat16)

    # conv2 (kernel (3,1), padding (1,0), stride 1) + bn2 + relu.
    # One fused (n, P) @ (P, 3P) matmul, then shift-add the three tap results along H
    # via sublane rolls (XLU) with boundary-row masks; no padded copy of y1.
    z = jnp.dot(y1, w2_ref[...], preferred_element_type=jnp.float32)        # (n, 3P)
    rows = jax.lax.broadcasted_iota(jnp.int32, (n, 1), 0)
    z_up = jnp.where(rows >= WT,                                            # input row h-1
                     pltpu.roll(z[:, :P], shift=WT, axis=0), 0.0)
    z_dn = jnp.where(rows < n - WT,                                         # input row h+1
                     pltpu.roll(z[:, 2 * P:], shift=n - WT, axis=0), 0.0)
    y2 = jnp.maximum(z[:, P:2 * P] + z_up + z_dn + b2_ref[...], 0.0)
    y2 = y2.astype(jnp.bfloat16)

    # conv3 (1x1) + bn3, identity residual (re-read x_ref here -> short live range),
    # final relu, single lane-dense store.
    y3 = jnp.dot(y2, w3_ref[...], preferred_element_type=jnp.float32) + b3_ref[...]
    out = jnp.maximum(y3 + x_ref[0].reshape(n, C), 0.0)
    o_ref[0] = out.reshape(H, WT, C)


def _vmem_capacity_bytes():
    """Per-core VMEM capacity; conservative fallback if the query is unavailable."""
    try:
        return int(pltpu.get_tpu_info().vmem_capacity_bytes)
    except Exception:
        return 64 * 1024 * 1024        # v7x-sized fallback, safe on all generations


def _step_vmem_bytes(H, wt, C, P):
    """Rough per-grid-step VMEM residency (used only to size the W tile)."""
    act = 2 * (2 * H * wt * C * 4)                        # double-buffered f32 in + out
    wts = 2 * ((C * P + 3 * P * P + P * C) * 2            # double-buffered bf16 weights
               + (2 * P + C) * 4)                         # f32 biases
    inter = H * wt * (3 * C + 10 * P) * 4                 # generous temporaries estimate
    return act + wts + inter


def _pick_wt_tile(W, H, C, P, B, budget):
    """Largest W tile (divisor of W, multiple of 8, or W itself) that fits the budget."""
    cands = [d for d in range(8, W + 1, 8) if W % d == 0] or [W]
    fitting = [d for d in cands if _step_vmem_bytes(H, d, C, P) <= budget]
    wt = max(fitting) if fitting else min(cands)
    # v7x megacore: prefer >= 2 grid steps so both TensorCores get work.
    if B * (W // wt) < 2:
        smaller = [d for d in cands if d < wt]
        if smaller:
            wt = max(smaller)
    return wt


def _fold_bn_params(params, eps):
    """Fold eval-mode BatchNorm into the bias-free convs; f32, matmul (cin, cout) layout."""
    w1, w2, w3 = params["w1"], params["w2"], params["w3"]
    P = w1.shape[0]

    def fold(bn):
        gamma, beta, mean, var = bn
        s = gamma * jax.lax.rsqrt(var + eps)
        return s, beta - mean * s

    s1, t1 = fold(params["bn1"])
    s2, t2 = fold(params["bn2"])
    s3, t3 = fold(params["bn3"])
    w1f = (w1 * s1[:, None]).T                                         # (C, P)
    w2s = w2 * s2[:, None, None]                                       # (P, P, 3) out,in,tap
    w2f = jnp.concatenate([w2s[:, :, t].T for t in range(3)], axis=1)  # (P, 3P)
    w3f = (w3 * s3[:, None]).T                                         # (P, C)
    return (w1f, t1.reshape(1, P), w2f, t2.reshape(1, P), w3f, t3.reshape(1, 4 * P))


def bottleneck_forward(x, params, *, eps=1e-5, wt_tile=None):
    """Fused Bottleneck3x3x1 forward (eval-mode BN, identity residual).

    x: (B, H, W, C) float32, channels-last.  This is the torch NCHW input permuted once
    at network entry; keeping NHWC end-to-end avoids per-block HBM transposes.
    Returns (B, H, W, C) float32.
    """
    B, H, W, C = x.shape
    w1, w2, w3 = params["w1"], params["w2"], params["w3"]
    P = w1.shape[0]                                   # planes
    assert C == 4 * P, "identity residual requires inplanes == planes * 4"
    assert w1.shape == (P, C) and w2.shape == (P, P, 3) and w3.shape == (C, P)

    w1f, b1f, w2f, b2f, w3f, b3f = _fold_bn_params(params, eps)
    # bf16 MXU operands (single pass), f32 biases / accumulation.
    w1f, w2f, w3f = (w.astype(jnp.bfloat16) for w in (w1f, w2f, w3f))

    # Generation-aware VMEM budget and W-tile selection.
    vmem_cap = _vmem_capacity_bytes()
    budget = int(0.70 * vmem_cap)
    if wt_tile is None:
        wt_tile = _pick_wt_tile(W, H, C, P, B, budget)
    assert W % wt_tile == 0 and (wt_tile == W or wt_tile % 8 == 0)

    kernel = functools.partial(_bottleneck_kernel, H=H, WT=wt_tile, P=P, C=C)
    return pl.pallas_call(
        kernel,
        out_shape=jax.ShapeDtypeStruct((B, H, W, C), jnp.float32),
        grid=(B, W // wt_tile),
        in_specs=[
            pl.BlockSpec((1, H, wt_tile, C), lambda b, j: (b, 0, j, 0)),
            pl.BlockSpec((C, P), lambda b, j: (0, 0)),
            pl.BlockSpec((1, P), lambda b, j: (0, 0)),
            pl.BlockSpec((P, 3 * P), lambda b, j: (0, 0)),
            pl.BlockSpec((1, P), lambda b, j: (0, 0)),
            pl.BlockSpec((P, C), lambda b, j: (0, 0)),
            pl.BlockSpec((1, C), lambda b, j: (0, 0)),
        ],
        out_specs=pl.BlockSpec((1, H, wt_tile, C), lambda b, j: (b, 0, j, 0)),
        compiler_params=pltpu.CompilerParams(
            dimension_semantics=("parallel", "parallel"),
            vmem_limit_bytes=budget),
    )(x, w1f, b1f, w2f, b2f, w3f, b3f)


def bottleneck_reference(x, params, eps=1e-5):
    """Pure-JAX NHWC reference following the PyTorch ops literally (f32, highest precision)."""
    w1, w2, w3 = params["w1"], params["w2"], params["w3"]
    H = x.shape[1]

    def mm(a, w):  # a: (B,H,W,Cin), w: (Cout, Cin)
        return jnp.einsum("bhwc,oc->bhwo", a, w, precision="highest")

    def bn(y, p):
        g, b, m, v = p
        s = g * jax.lax.rsqrt(v + eps)
        return (y - m) * s + b

    y = jax.nn.relu(bn(mm(x, w1), params["bn1"]))
    yp = jnp.pad(y, ((0, 0), (1, 1), (0, 0), (0, 0)))          # conv2 padding (1, 0)
    y = sum(mm(yp[:, t:t + H], w2[:, :, t]) for t in range(3))
    y = jax.nn.relu(bn(y, params["bn2"]))
    y = bn(mm(y, w3), params["bn3"])
    return jax.nn.relu(y + x)


def bottleneck_reference_staged(x, params, eps=1e-5):
    """Mirrors the kernel's numerics exactly (folded BN, bf16 MXU operands, f32 accumulate)."""
    B, H, W, C = x.shape
    w1f, b1, w2f, b2, w3f, b3 = _fold_bn_params(params, eps)
    P = b1.shape[-1]
    bf = jnp.bfloat16

    def mm(a, w):  # a: (B,H,W,K) f32, w: (K,N) f32
        return jnp.einsum("bhwk,kn->bhwn", a.astype(bf), w.astype(bf),
                          preferred_element_type=jnp.float32)

    y1 = jax.nn.relu(mm(x, w1f) + b1)
    yp = jnp.pad(y1, ((0, 0), (1, 1), (0, 0), (0, 0)))
    y2 = sum(mm(yp[:, t:t + H], w2f[:, t * P:(t + 1) * P]) for t in range(3))
    y2 = jax.nn.relu(y2 + b2)
    y3 = mm(y2, w3f) + b3
    return jax.nn.relu(y3 + x)


def make_params(key, planes, in_ch):
    """Deterministic synthetic params (roughly PyTorch default init scales)."""
    p = planes
    ks = jax.random.split(key, 6)

    def u(k, shape, fan_in):
        b = 1.0 / math.sqrt(fan_in)
        return jax.random.uniform(k, shape, jnp.float32, -b, b)

    def make_bn(k, n):
        k1, k2, k3, k4 = jax.random.split(k, 4)
        gamma = jax.random.uniform(k1, (n,), jnp.float32, 0.5, 1.5)
        beta = jax.random.uniform(k2, (n,), jnp.float32, -0.5, 0.5)
        mean = jax.random.uniform(k3, (n,), jnp.float32, -0.5, 0.5)
        var = jax.random.uniform(k4, (n,), jnp.float32, 0.5, 1.5)
        return (gamma, beta, mean, var)

    return {
        "w1": u(ks[0], (p, in_ch), in_ch),        # conv1: (planes, inplanes)
        "w2": u(ks[1], (p, p, 3), p * 3),         # conv2: (planes, planes, 3[,1])
        "w3": u(ks[2], (4 * p, p), p),            # conv3: (4*planes, planes)
        "bn1": make_bn(ks[3], p),
        "bn2": make_bn(ks[4], p),
        "bn3": make_bn(ks[5], 4 * p),
    }


if __name__ == "__main__":
    # Small but lane-dense config: planes=32 -> C=128 (one full vreg lane width).
    B, planes, H, W = 2, 32, 16, 16
    C = 4 * planes                                  # inplanes == planes * 4

    key = jax.random.PRNGKey(0)
    key, xkey = jax.random.split(key)
    x = jax.random.normal(xkey, (B, H, W, C), jnp.float32)     # channels-last (NHWC)
    params = make_params(key, planes, C)

    out = jax.block_until_ready(bottleneck_forward(x, params))

    # Tight structural check vs. a pure-JAX implementation of the *same* numerics
    # (folded BN, bf16 MXU operands, f32 accumulation): catches any shift/tap/bias/
    # residual bug while being insensitive to the deliberate precision choice.
    ref_staged = bottleneck_reference_staged(x, params)
    err_staged = float(jnp.max(jnp.abs(out - ref_staged)))
    assert jnp.allclose(out, ref_staged, atol=5e-3, rtol=5e-3), err_staged

    # Semantic check vs. the literal (f32, highest-precision) PyTorch-faithful reference.
    # Tolerance is deliberately relaxed for the bf16 MXU staging (three matmul stages,
    # BN scales up to ~2); structural bugs would produce O(0.5-5) errors.
    ref = bottleneck_reference(x, params)
    assert out.shape == ref.shape == (B, H, W, C), out.shape
    err = float(jnp.max(jnp.abs(out - ref)))
    assert jnp.allclose(out, ref, atol=0.2, rtol=0.1), err

    print("KERNEL_OK")
</pallas_src>

<mosaic_0001>
module attributes {stable_mosaic.version = 11 : i64} {
  func.func @_bottleneck_kernel(%arg0: i32, %arg1: i32, %arg2: memref<1x16x16x128xf32, #tpu.memory_space<vmem>>, %arg3: memref<128x32xbf16, #tpu.memory_space<vmem>>, %arg4: memref<1x32xf32, #tpu.memory_space<vmem>>, %arg5: memref<32x96xbf16, #tpu.memory_space<vmem>>, %arg6: memref<1x32xf32, #tpu.memory_space<vmem>>, %arg7: memref<32x128xbf16, #tpu.memory_space<vmem>>, %arg8: memref<1x128xf32, #tpu.memory_space<vmem>>, %arg9: memref<1x16x16x128xf32, #tpu.memory_space<vmem>>) attributes {dimension_semantics = [#tpu.dimension_semantics<parallel>, #tpu.dimension_semantics<parallel>], iteration_bounds = array<i64: 2, 1>, scalar_prefetch = 0 : i64, scratch_operands = 0 : i64, tpu.core_type = #tpu.core_type<tc>, window_params = [{transform_indices = @transform_0, window_bounds = array<i64: 1, 16, 16, 128>}, {pipeline_mode = #tpu.pipeline_mode<synchronous>, transform_indices = @transform_1, window_bounds = array<i64: 128, 32>}, {pipeline_mode = #tpu.pipeline_mode<synchronous>, transform_indices = @transform_2, window_bounds = array<i64: 1, 32>}, {pipeline_mode = #tpu.pipeline_mode<synchronous>, transform_indices = @transform_3, window_bounds = array<i64: 32, 96>}, {pipeline_mode = #tpu.pipeline_mode<synchronous>, transform_indices = @transform_4, window_bounds = array<i64: 1, 32>}, {pipeline_mode = #tpu.pipeline_mode<synchronous>, transform_indices = @transform_5, window_bounds = array<i64: 32, 128>}, {pipeline_mode = #tpu.pipeline_mode<synchronous>, transform_indices = @transform_6, window_bounds = array<i64: 1, 128>}, {transform_indices = @transform_7, window_bounds = array<i64: 1, 16, 16, 128>}]} {
    %c0 = arith.constant 0 : index
    %c0_0 = arith.constant 0 : index
    %c0_1 = arith.constant 0 : index
    %c0_2 = arith.constant 0 : index
    %0 = vector.load %arg2[%c0, %c0_0, %c0_1, %c0_2] : memref<1x16x16x128xf32, #tpu.memory_space<vmem>>, vector<1x16x16x128xf32>
    %1 = vector.shape_cast %0 : vector<1x16x16x128xf32> to vector<16x16x128xf32>
    %2 = vector.shape_cast %1 : vector<16x16x128xf32> to vector<256x128xf32>
    %3 = arith.truncf %2 : vector<256x128xf32> to vector<256x128xbf16>
    %c0_3 = arith.constant 0 : index
    %c0_4 = arith.constant 0 : index
    %4 = vector.load %arg3[%c0_3, %c0_4] : memref<128x32xbf16, #tpu.memory_space<vmem>>, vector<128x32xbf16>
    %cst = arith.constant dense<0.000000e+00> : vector<256x32xf32>
    %5 = tpu.matmul %3, %4, %cst {dimension_numbers = #tpu.dot_dimension_numbers<[1], [0], [0], [1], [0, 0, 1, 1], [], []>} : vector<256x128xbf16>, vector<128x32xbf16>, vector<256x32xf32> -> vector<256x32xf32>
    %c0_5 = arith.constant 0 : index
    %c0_6 = arith.constant 0 : index
    %6 = vector.load %arg4[%c0_5, %c0_6] : memref<1x32xf32, #tpu.memory_space<vmem>>, vector<1x32xf32>
    %7 = vector.broadcast %6 : vector<1x32xf32> to vector<256x32xf32>
    %8 = arith.addf %5, %7 : vector<256x32xf32>
    %cst_7 = arith.constant 0.000000e+00 : f32
    %9 = vector.broadcast %cst_7 : f32 to vector<256x32xf32>
    %10 = arith.maximumf %8, %9 : vector<256x32xf32>
    %11 = arith.truncf %10 : vector<256x32xf32> to vector<256x32xbf16>
    %c0_8 = arith.constant 0 : index
    %c0_9 = arith.constant 0 : index
    %12 = vector.load %arg5[%c0_8, %c0_9] : memref<32x96xbf16, #tpu.memory_space<vmem>>, vector<32x96xbf16>
    %cst_10 = arith.constant dense<0.000000e+00> : vector<256x96xf32>
    %13 = tpu.matmul %11, %12, %cst_10 {dimension_numbers = #tpu.dot_dimension_numbers<[1], [0], [0], [1], [0, 0, 1, 1], [], []>} : vector<256x32xbf16>, vector<32x96xbf16>, vector<256x96xf32> -> vector<256x96xf32>
    %14 = tpu.iota {dimensions = array<i32: 0>} : vector<256x1xi32>
    %c16_i32 = arith.constant 16 : i32
    %15 = vector.broadcast %c16_i32 : i32 to vector<256x1xi32>
    %16 = arith.cmpi sge, %14, %15 : vector<256x1xi32>
    %17 = vector.extract_strided_slice %13 {offsets = [0, 0], sizes = [256, 32], strides = [1, 1]} : vector<256x96xf32> to vector<256x32xf32>
    %c16_i32_11 = arith.constant 16 : i32
    %18 = tpu.dynamic_rotate %17 by %c16_i32_11 dim 0 : vector<256x32xf32>, i32 -> vector<256x32xf32>
    %cst_12 = arith.constant 0.000000e+00 : f32
    %19 = vector.shape_cast %16 : vector<256x1xi1> to vector<256x1xi1>
    %20 = vector.broadcast %19 : vector<256x1xi1> to vector<256x32xi1>
    %21 = vector.broadcast %cst_12 : f32 to vector<256x32xf32>
    %22 = arith.select %20, %18, %21 : vector<256x32xi1>, vector<256x32xf32>
    %c240_i32 = arith.constant 240 : i32
    %23 = vector.broadcast %c240_i32 : i32 to vector<256x1xi32>
    %24 = arith.cmpi slt, %14, %23 : vector<256x1xi32>
    %25 = vector.extract_strided_slice %13 {offsets = [0, 64], sizes = [256, 32], strides = [1, 1]} : vector<256x96xf32> to vector<256x32xf32>
    %c240_i32_13 = arith.constant 240 : i32
    %26 = tpu.dynamic_rotate %25 by %c240_i32_13 dim 0 : vector<256x32xf32>, i32 -> vector<256x32xf32>
    %cst_14 = arith.constant 0.000000e+00 : f32
    %27 = vector.shape_cast %24 : vector<256x1xi1> to vector<256x1xi1>
    %28 = vector.broadcast %27 : vector<256x1xi1> to vector<256x32xi1>
    %29 = vector.broadcast %cst_14 : f32 to vector<256x32xf32>
    %30 = arith.select %28, %26, %29 : vector<256x32xi1>, vector<256x32xf32>
    %31 = vector.extract_strided_slice %13 {offsets = [0, 32], sizes = [256, 32], strides = [1, 1]} : vector<256x96xf32> to vector<256x32xf32>
    %32 = arith.addf %31, %22 : vector<256x32xf32>
    %33 = arith.addf %32, %30 : vector<256x32xf32>
    %c0_15 = arith.constant 0 : index
    %c0_16 = arith.constant 0 : index
    %34 = vector.load %arg6[%c0_15, %c0_16] : memref<1x32xf32, #tpu.memory_space<vmem>>, vector<1x32xf32>
    %35 = vector.broadcast %34 : vector<1x32xf32> to vector<256x32xf32>
    %36 = arith.addf %33, %35 : vector<256x32xf32>
    %cst_17 = arith.constant 0.000000e+00 : f32
    %37 = vector.broadcast %cst_17 : f32 to vector<256x32xf32>
    %38 = arith.maximumf %36, %37 : vector<256x32xf32>
    %39 = arith.truncf %38 : vector<256x32xf32> to vector<256x32xbf16>
    %c0_18 = arith.constant 0 : index
    %c0_19 = arith.constant 0 : index
    %40 = vector.load %arg7[%c0_18, %c0_19] : memref<32x128xbf16, #tpu.memory_space<vmem>>, vector<32x128xbf16>
    %cst_20 = arith.constant dense<0.000000e+00> : vector<256x128xf32>
    %41 = tpu.matmul %39, %40, %cst_20 {dimension_numbers = #tpu.dot_dimension_numbers<[1], [0], [0], [1], [0, 0, 1, 1], [], []>} : vector<256x32xbf16>, vector<32x128xbf16>, vector<256x128xf32> -> vector<256x128xf32>
    %c0_21 = arith.constant 0 : index
    %c0_22 = arith.constant 0 : index
    %42 = vector.load %arg8[%c0_21, %c0_22] : memref<1x128xf32, #tpu.memory_space<vmem>>, vector<1x128xf32>
    %43 = vector.broadcast %42 : vector<1x128xf32> to vector<256x128xf32>
    %44 = arith.addf %41, %43 : vector<256x128xf32>
    %c0_23 = arith.constant 0 : index
    %c0_24 = arith.constant 0 : index
    %c0_25 = arith.constant 0 : index
    %c0_26 = arith.constant 0 : index
    %45 = vector.load %arg2[%c0_23, %c0_24, %c0_25, %c0_26] : memref<1x16x16x128xf32, #tpu.memory_space<vmem>>, vector<1x16x16x128xf32>
    %46 = vector.shape_cast %45 : vector<1x16x16x128xf32> to vector<16x16x128xf32>
    %47 = vector.shape_cast %46 : vector<16x16x128xf32> to vector<256x128xf32>
    %48 = arith.addf %44, %47 : vector<256x128xf32>
    %cst_27 = arith.constant 0.000000e+00 : f32
    %49 = vector.broadcast %cst_27 : f32 to vector<256x128xf32>
    %50 = arith.maximumf %48, %49 : vector<256x128xf32>
    %51 = vector.shape_cast %50 : vector<256x128xf32> to vector<16x16x128xf32>
    %c0_28 = arith.constant 0 : index
    %c0_29 = arith.constant 0 : index
    %c0_30 = arith.constant 0 : index
    %c0_31 = arith.constant 0 : index
    %52 = vector.load %arg9[%c0_28, %c0_29, %c0_30, %c0_31] : memref<1x16x16x128xf32, #tpu.memory_space<vmem>>, vector<1x16x16x128xf32>
    %53 = vector.shape_cast %52 : vector<1x16x16x128xf32> to vector<16x16x128xf32>
    %54 = vector.shape_cast %51 : vector<16x16x128xf32> to vector<1x16x16x128xf32>
    tpu.vector_store %arg9[%c0_28, %c0_29, %c0_30, %c0_31], %54 {strides = array<i32>} : memref<1x16x16x128xf32, #tpu.memory_space<vmem>>, vector<1x16x16x128xf32>,
    return
  }
  func.func @transform_0(%arg0: i32, %arg1: i32) -> (i32, i32, i32, i32) {
    %c0_i32 = arith.constant 0 : i32
    %c0_i32_0 = arith.constant 0 : i32
    %c0_i32_1 = arith.constant 0 : i32
    return %arg0, %c0_i32, %arg1, %c0_i32_0 : i32, i32, i32, i32
  }
  func.func @transform_1(%arg0: i32, %arg1: i32) -> (i32, i32) {
    %c0_i32 = arith.constant 0 : i32
    %c0_i32_0 = arith.constant 0 : i32
    %c0_i32_1 = arith.constant 0 : i32
    return %c0_i32, %c0_i32_0 : i32, i32
  }
  func.func @transform_2(%arg0: i32, %arg1: i32) -> (i32, i32) {
    %c0_i32 = arith.constant 0 : i32
    %c0_i32_0 = arith.constant 0 : i32
    %c0_i32_1 = arith.constant 0 : i32
    return %c0_i32, %c0_i32_0 : i32, i32
  }
  func.func @transform_3(%arg0: i32, %arg1: i32) -> (i32, i32) {
    %c0_i32 = arith.constant 0 : i32
    %c0_i32_0 = arith.constant 0 : i32
    %c0_i32_1 = arith.constant 0 : i32
    return %c0_i32, %c0_i32_0 : i32, i32
  }
  func.func @transform_4(%arg0: i32, %arg1: i32) -> (i32, i32) {
    %c0_i32 = arith.constant 0 : i32
    %c0_i32_0 = arith.constant 0 : i32
    %c0_i32_1 = arith.constant 0 : i32
    return %c0_i32, %c0_i32_0 : i32, i32
  }
  func.func @transform_5(%arg0: i32, %arg1: i32) -> (i32, i32) {
    %c0_i32 = arith.constant 0 : i32
    %c0_i32_0 = arith.constant 0 : i32
    %c0_i32_1 = arith.constant 0 : i32
    return %c0_i32, %c0_i32_0 : i32, i32
  }
  func.func @transform_6(%arg0: i32, %arg1: i32) -> (i32, i32) {
    %c0_i32 = arith.constant 0 : i32
    %c0_i32_0 = arith.constant 0 : i32
    %c0_i32_1 = arith.constant 0 : i32
    return %c0_i32, %c0_i32_0 : i32, i32
  }
  func.func @transform_7(%arg0: i32, %arg1: i32) -> (i32, i32, i32, i32) {
    %c0_i32 = arith.constant 0 : i32
    %c0_i32_0 = arith.constant 0 : i32
    %c0_i32_1 = arith.constant 0 : i32
    return %arg0, %c0_i32, %arg1, %c0_i32_0 : i32, i32, i32, i32
  }
}

</mosaic_0001>

<bundles_post_ra>
// kernel: tpu_custom_call.1
= control target key start
LH: loop header
LB: loop body
LE: loop exit
PB: predicated region body
PF: predicated region fallthrough
CT: control target
= control target key end

     0   :  { %12 = vsyncpa [#allocation3], 0  ;;  %s3528_s0 = inlined_call_operand.hbm [shape: f32[2,16,16,128], index: 0, kind: input, shape index: {}]   ;;  %s3529_s1 = inlined_call_operand.vmem [shape: bf16[128,32], index: 1, kind: input, shape index: {}]   ;;  %s3530_s2 = inlined_call_operand.vmem [shape: f32[1,32], index: 2, kind: input, shape index: {}]   ;;  %s3531_s3 = inlined_call_operand.vmem [shape: bf16[32,96], index: 3, kind: input, shape index: {}]   ;;  %s3532_s4 = inlined_call_operand.vmem [shape: f32[1,32], index: 4, kind: input, shape index: {}]   ;;  %s3533_s5 = inlined_call_operand.vmem [shape: bf16[32,128], index: 5, kind: input, shape index: {}]   ;;  %s3534_s6 = inlined_call_operand.vmem [shape: f32[1,128], index: 6, kind: input, shape index: {}]   ;;  %s3535_s7 = inlined_call_operand.hbm [shape: f32[2,16,16,128], index: 7, kind: output, shape index: {}]  }
   0x1   :  { %14 = vsyncpa [#allocation3 + $0x1], 0 }
   0x2   :  { %15 = vsyncpa [#allocation4], 0 }
   0x3   :  { %17 = vsyncpa [#allocation4 + $0x1], 0  ;;  %s2717_s24 = smov 0   ;;  %s2719_s25 = smov 0  }
   0x4   :  { %s2721_s26 = smov 0   ;;  %s2723_s27 = smov 0  }
   0x5   :  { %s2725_s28 = smov 0   ;;  %s2727_s29 = smov 0  }
   0x6 LB: > { %s2177_s30 = sadd.s32 4294967295, %s2665_s29   ;;  %s2178_s8 = sadd.s32 4294967294, %s2665_s29   ;;  %s2665_s29 = sphi %s2727_s29, %s23_s29   ;;  %s2661_s28 = sphi %s2725_s28, %s3550_s28   ;;  %s2657_s27 = sphi %s2723_s27, %s3549_s27   ;;  %s2653_s26 = sphi %s2721_s26, %s3548_s26   ;;  %s2649_s25 = sphi %s2719_s25, %s3547_s25   ;;  %s2645_s24 = sphi %s2717_s24, %s3546_s24  }
   0x7   : > { %s35_s9 = sadd.s32 1, %s2661_s28  ;;  %s44_s10 = sadd.s32 1, %s2653_s26 }
   0x8   : > { %p37_p0 = scmp.ge.s32.totalorder %s35_s9, 2  ;;  %p51_p1 = scmp.ne.s32.totalorder %s2653_s26, %s2649_s25 }
   0x9   : > { %p52_p2 = scmp.eq.s32.totalorder %s2665_s29, 0  ;;  %p57_p3 = scmp.ne.s32.totalorder %s2649_s25, %s2645_s24 }
   0xa   : > { %s3552_s9 = smov (%p37_p0, %s35_s9), 0  ;;  %p58_p5 = scmp.eq.s32.totalorder %s2177_s30, 0 }
   0xb   : > { %p2758_p4 = por %p52_p2, %p51_p1  ;;  %s39_s12 = ssub.s32 %s2661_s28, %s3552_s9 }
   0xc   : > { %p209_p6 = scmp.eq.s32.totalorder %s2177_s30, 1  ;;  %p42_p7 = scmp.eq.s32.totalorder %s39_s12, 0 }
   0xd   : > { %p2764_p8 = por %p58_p5, %p57_p3  ;;  %p215_p10 = scmp.eq.s32.totalorder %s2178_s8, 1 }
   0xe   : > { %p2768_p9 = por %p209_p6, %p51_p1  ;;  %p2437_p13 = scmp.lt.s32.totalorder %s2665_s29, 2 }
   0xf   : > { %s2773_s15 = scalar_select %p42_p7, %s2653_s26, %s44_s10  }
  0x10   : > { %s3539_s14 = scalar_select %p2768_p9, 1, 0 }
  0x11   : > { %p2775_p11 = por %p215_p10, %p57_p3  ;;  %s253_s17 = sand.u32 1, %s2653_s26  }
  0x12   : > { %s2181_s18 = sshll.u32 %s253_s17, 8  ;;  %s2239_s19 = sshll.u32 %s2661_s28, 12 }
  0x13   : > { %s3540_s16 = scalar_select %p2775_p11, 1, 0 }
  0x14   : > { %s2786_s22 = scalar_lea.hbm %s3528_s0, %s2239_s19  ;;  %s257_s23 = scalar_lea.vmem [#allocation2], %s2181_s18 }
  0x15   : > { %s266_s30 = sshll.u32 %s257_s23, 4  ;;  %p2792_p0 = pnand %p2437_p13, %p2758_p4  ;;  %s2788_s30 = int_to_ptr.vmem [resolvable:$true] %s266_s30 }
  0x16   : > { %s2797_s10 = scalar_lea.sflag [#allocation3], %s253_s17  ;;  %s2553_s12 = scalar_lea.hbm %s2786_s22, 4096 }
  0x17   : > { %p2554_p2 = scmp.ne.s32.totalorder %s2786_s22, %s2553_s12  ;;  %p2555_p3 = pneg %p2792_p0 }
  0x18   : > { %s2558_s11 = scalar_lea.hbm %s3528_s0, 8192  ;;  %p2559_p4 = scmp.lt.u32.totalorder %s2786_s22, %s3528_s0 }
  0x19   : > { %p2556_p5 = pnand %p2555_p3, %p2554_p2  ;;  %p2560_p7 = scmp.lt.u32.totalorder %s2558_s11, %s2553_s12 }
  0x1a   : > { %p2562_p13 = scmp.lt.u32.totalorder %s2553_s12, %s2786_s22 }
  0x1b   : > { %p2557_p6 = pneg %p2556_p5  ;;  %p2561_p10 = por %p2560_p7, %p2559_p4 }
  0x1d   : > { %p2563_p12 = por %p2562_p13, %p2561_p10 }
  0x1f   : > { %p2564_p1 = pnand %p2563_p12, %p2557_p6 }
  0x21   : > { %2567 = shalt.err (!%p2564_p1)
}
  0x22   : > { %s2568_s17 = scalar_lea.vmem %s2788_s30, 4096  ;;  %s2667_s23 = smov [#allocation2]  }
  0x23   : > { %p2569_p2 = scmp.ne.s32.totalorder %s2788_s30, %s2568_s17  ;;  %s2573_s18 = sshll.u32 %s2667_s23, 4  ;;  %s2574_s18 = int_to_ptr.vmem [resolvable:$false] %s2573_s18 }
  0x24   : > { %s2575_s19 = scalar_lea.vmem %s2574_s18, 8192  ;;  %p2576_p9 = scmp.lt.s32.totalorder %s2788_s30, %s2574_s18 }
  0x25   : > { %p2571_p5 = pnand %p2569_p2, %p2555_p3  ;;  %p2577_p4 = scmp.lt.s32.totalorder %s2575_s19, %s2568_s17 }
  0x27   : > { %p2572_p11 = pneg %p2571_p5  ;;  %p2578_p7 = por %p2577_p4, %p2576_p9 }
  0x29   : > { %p2579_p10 = pnand %p2578_p7, %p2572_p11 }
  0x2b   : > { %2582 = shalt.err (!%p2579_p10)
}
  0x2c   : > { %s2668_s12 = smov 128   ;;  %s2669_s11 = smov 8  }
  0x2d   : > { %2432 = dma.hbm_to_vmem [thread:$0]  (!%p2792_p0), %s2786_s22, 4096, %s2788_s30, %s2797_s10, %s2668_s12, %s2668_s12, %s2669_s11  }
  0x2e   : > { %p274_p12 = scmp.lt.s32.totalorder %s2665_s29, 3  ;;  %p3542_p1 = scmp.ge.s32.totalorder %s2665_s29, 1 }
  0x30   : > { %p275_p3 = pnand %p3542_p1, %p274_p12 }
  0x31   : > { %s2829_s20 = sand.u32 (!%p275_p3), 1, %s2649_s25  }
  0x32   : > { %278 = sbr.rel (%p275_p3) target bundleno = 1234 (0x4d2), region = 48  ;;  %s2185_s21 = sshll.u32 (!%p275_p3), %s2829_s20, 8 }
  0x33   : > { %s281_s17 = scalar_lea.sflag (!%p275_p3), [#allocation3], %s2829_s20  ;;  %s2835_s23 = scalar_lea.vmem (!%p275_p3), [#allocation2], %s2185_s21 }
  0x39   : > { %2636 = dma.done.wait (%p2764_p8), %s281_s17, 4096  }
  0x3a   : > { %2638 = vsyncadd (%p2764_p8), %s281_s17, 4294963200  ;;  %v2505_v0 = vld [vmem:[%s3529_s1] sm:$0xff]   ;;  %v2506_v1 = vld [vmem:[%s3529_s1 + $0x8] sm:$0xff]   ;;  %v2670_v58 = vmov 0.0   ;;  %s2671_s22 = smov 32   ;;  %vm662_vm0 = vcmask 261120  }
  0x3b   : > { %2301 = vmatprep.subr.bf16.mxu0 %v2505_v0  ;;  %v2507_v2 = vld [vmem:[%s3529_s1 + $0x10] sm:$0xff]   ;;  %v2508_v3 = vld [vmem:[%s3529_s1 + $0x18] sm:$0xff]   ;;  %v318_v4 = vld [vmem:[%s2835_s23] sm:$0xff]  ;;  %2496 = vrot.lane.b32.xlu0 %v2670_v58, %s2671_s22  ;;  %s2672_s19 = smov 64   ;;  %s3382_s10 = scalar_lea.vmem [#allocation5], %s2185_s21 }
  0x3c   : > { %2302 = vmatpush3.bf16.msra.mxu0 %v2505_v0  ;;  %v319_v5 = vld [vmem:[%s2835_s23 + $0x8] sm:$0xff]  ;;  %v2509_v7 = vld [vmem:[%s3529_s1 + $0x20] sm:$0xff]   ;;  %v2511_v9 = vld [vmem:[%s3529_s1 + $0x30] sm:$0xff]   ;;  %s2240_s21 = sshll.u32 %s2657_s27, 12  ;;  %s2090_s18 = sshll.u32 %s3382_s10, 4  ;;  %s3476_s18 = int_to_ptr.vmem [resolvable:$true] %s2090_s18 }
  0x3d   : > { %2303 = vmatprep.subr.bf16.mxu0 %v2506_v1  ;;  %v350_v6 = vpack.c.bf16 %v319_v5, %v318_v4  ;;  %v2510_v8 = vld [vmem:[%s3529_s1 + $0x28] sm:$0xff]   ;;  %v2513_v10 = vld [vmem:[%s3531_s3] sm:$0xff]   ;;  %v2512_v12 = vld [vmem:[%s3529_s1 + $0x38] sm:$0xff]   ;;  %s3474_s12 = scalar_lea.hbm %s3535_s7, %s2240_s21  ;;  %s2075_s27 = scalar_lea.sflag [#allocation4], %s2829_s20 }
  0x3e   : > { %v2514_v11 = vld [vmem:[%s3531_s3 + $0x8] sm:$0xff]   ;;  %2421 = vmatprep.subr.bf16.mxu1 %v2513_v10  ;;  %v320_v13 = vld [vmem:[%s2835_s23 + $0x10] sm:$0xff]  ;;  %v321_v14 = vld [vmem:[%s2835_s23 + $0x18] sm:$0xff]  ;;  %s2583_s11 = scalar_lea.vmem %s3476_s18, 4096  ;;  %p3543_p9 = scmp.ne.s32.totalorder %s3539_s14, 0 }
  0x3f   : > { %2317 = vmatprep.mubr.bf16.mxu0 %v350_v6  ;;  %2423 = vmatpush3.bf16.msra.mxu1 %v2513_v10  ;;  %v322_v15 = vld [vmem:[%s2835_s23 + $0x20] sm:$0xff]  ;;  %v323_v16 = vld [vmem:[%s2835_s23 + $0x28] sm:$0xff]  ;;  %v351_v17 = vpack.c.bf16 %v321_v14, %v320_v13  ;;  %v324_v19 = vld [vmem:[%s2835_s23 + $0x30] sm:$0xff]  ;;  %p2584_p8 = scmp.ne.s32.totalorder %s3476_s18, %s2583_s11 }
  0x40   : > { %2304 = vmatpush3.bf16.msra.mxu0 %v2506_v1  ;;  %2422 = vmatprep.subr.bf16.mxu1 %v2514_v11  ;;  %v352_v18 = vpack.c.bf16 %v323_v16, %v322_v15  ;;  %v325_v20 = vld [vmem:[%s2835_s23 + $0x38] sm:$0xff]  ;;  %v326_v21 = vld [vmem:[%s2835_s23 + $0x40] sm:$0xff]  ;;  %v327_v22 = vld [vmem:[%s2835_s23 + $0x48] sm:$0xff] }
  0x41   : > { %2305 = vmatprep.subr.bf16.mxu0 %v2507_v2  ;;  %v353_v23 = vpack.c.bf16 %v325_v20, %v324_v19  ;;  %v354_v24 = vpack.c.bf16 %v327_v22, %v326_v21  ;;  %v328_v25 = vld [vmem:[%s2835_s23 + $0x50] sm:$0xff]  ;;  %v329_v26 = vld [vmem:[%s2835_s23 + $0x58] sm:$0xff]  ;;  %v330_v27 = vld [vmem:[%s2835_s23 + $0x60] sm:$0xff]  ;;  %p2585_p11 = pnand %p2584_p8, %p3543_p9 }
  0x42   : > { %v331_v28 = vld [vmem:[%s2835_s23 + $0x68] sm:$0xff]  ;;  %v355_v29 = vpack.c.bf16 %v329_v26, %v328_v25  ;;  %v332_v31 = vld [vmem:[%s2835_s23 + $0x70] sm:$0xff]  ;;  %v333_v32 = vld [vmem:[%s2835_s23 + $0x78] sm:$0xff] }
  0x43   : > { %2424 = vmatpush3.bf16.msra.mxu1 %v2514_v11  ;;  %v356_v30 = vpack.c.bf16 %v331_v28, %v330_v27  ;;  %v334_v33 = vld [vmem:[%s2835_s23 + $0x80] sm:$0xff]  ;;  %v335_v34 = vld [vmem:[%s2835_s23 + $0x88] sm:$0xff]  ;;  %v357_v35 = vpack.c.bf16 %v333_v32, %v332_v31  ;;  %v336_v37 = vld [vmem:[%s2835_s23 + $0x90] sm:$0xff]  ;;  %p2586_p0 = pneg %p2585_p11 }
  0x44   : > { %2306 = vmatpush3.bf16.msra.mxu0 %v2507_v2  ;;  %v358_v36 = vpack.c.bf16 %v335_v34, %v334_v33  ;;  %v337_v38 = vld [vmem:[%s2835_s23 + $0x98] sm:$0xff]  ;;  %v338_v39 = vld [vmem:[%s2835_s23 + $0xa0] sm:$0xff]  ;;  %v339_v40 = vld [vmem:[%s2835_s23 + $0xa8] sm:$0xff] }
  0x45   : > { %2307 = vmatprep.subr.bf16.mxu0 %v2508_v3  ;;  %v359_v41 = vpack.c.bf16 %v337_v38, %v336_v37  ;;  %v360_v42 = vpack.c.bf16 %v339_v40, %v338_v39  ;;  %v340_v43 = vld [vmem:[%s2835_s23 + $0xb0] sm:$0xff]  ;;  %v341_v44 = vld [vmem:[%s2835_s23 + $0xb8] sm:$0xff]  ;;  %v342_v45 = vld [vmem:[%s2835_s23 + $0xc0] sm:$0xff] }
  0x46   : > { %v343_v46 = vld [vmem:[%s2835_s23 + $0xc8] sm:$0xff]  ;;  %v361_v47 = vpack.c.bf16 %v341_v44, %v340_v43  ;;  %v344_v49 = vld [vmem:[%s2835_s23 + $0xd0] sm:$0xff]  ;;  %v345_v50 = vld [vmem:[%s2835_s23 + $0xd8] sm:$0xff] }
  0x47   : > { %v362_v48 = vpack.c.bf16 %v343_v46, %v342_v45  ;;  %v346_v51 = vld [vmem:[%s2835_s23 + $0xe0] sm:$0xff]  ;;  %v347_v52 = vld [vmem:[%s2835_s23 + $0xe8] sm:$0xff]  ;;  %v363_v53 = vpack.c.bf16 %v345_v50, %v344_v49  ;;  %v348_v55 = vld [vmem:[%s2835_s23 + $0xf0] sm:$0xff] }
  0x48   : > { %2308 = vmatpush3.bf16.msra.mxu0 %v2508_v3  ;;  %v364_v54 = vpack.c.bf16 %v347_v52, %v346_v51  ;;  %v349_v56 = vld [vmem:[%s2835_s23 + $0xf8] sm:$0xff]  ;;  %v2214_v59 = vld [vmem:[%s3532_s4] ss:$0 sm:$0xff] }
  0x49   : > { %2309 = vmatprep.subr.bf16.mxu0 %v2509_v7  ;;  %v365_v57 = vpack.c.bf16 %v349_v56, %v348_v55  ;;  %1615 = vrot.lane.b32.xlu1 %v2214_v59, %s2671_s22  ;;  %v2912_v60 = vld [vmem:[%s3530_s2] ss:$0 sm:$0xff] }
  0x4c   : > { %2310 = vmatpush3.bf16.msra.mxu0 %v2509_v7 }
  0x4d   : > { %2311 = vmatprep.subr.bf16.mxu0 %v2510_v8 }
  0x50   : > { %2312 = vmatpush3.bf16.msra.mxu0 %v2510_v8 }
  0x51   : > { %2313 = vmatprep.subr.bf16.mxu0 %v2511_v9 }
  0x54   : > { %2314 = vmatpush3.bf16.msra.mxu0 %v2511_v9 }
  0x55   : > { %2315 = vmatprep.subr.bf16.mxu0 %v2512_v12 }
  0x58   : > { %2316 = vmatpush3.bf16.msra.mxu0 %v2512_v12 }
  0x59   : > { %2349 = vmatprep.subr.bf16.mxu0 %v2513_v10 }
  0x5b   : > { %2318 = vmatmul.mubr.bf16.vlgmr.msra.gmra.mrb[0].mxu0 %v351_v17 }
  0x5c   : > { %2321 = vmatprep.mubr.bf16.mxu0 %v352_v18  ;;  %2350 = vmatpush3.bf16.msra.mxu0 %v2513_v10 }
  0x5d   : > { %2351 = vmatprep.subr.bf16.mxu0 %v2514_v11 }
  0x60   : > { %2352 = vmatpush3.bf16.msra.mxu0 %v2514_v11 }
  0x63   : > { %2322 = vmatmul.mubr.bf16.gmra.mrb[4].mxu0 %v353_v23 }
  0x64   : > { %2325 = vmatprep.mubr.bf16.mxu0 %v354_v24 }
  0x6b   : > { %2326 = vmatmul.mubr.bf16.gmra.mrb[8].mxu0 %v355_v29 }
  0x6c   : > { %2329 = vmatprep.mubr.bf16.mxu0 %v356_v30 }
  0x73   : > { %2330 = vmatmul.mubr.bf16.gmra.mrb[12].mxu0 %v357_v35 }
  0x74   : > { %2333 = vmatprep.mubr.bf16.mxu0 %v358_v36 }
  0x7b   : > { %2334 = vmatmul.mubr.bf16.gmra.mrb[16].mxu0 %v359_v41 }
  0x7c   : > { %2337 = vmatprep.mubr.bf16.mxu0 %v360_v42 }
  0x83   : > { %2338 = vmatmul.mubr.bf16.gmra.mrb[20].mxu0 %v361_v47 }
  0x84   : > { %2341 = vmatprep.mubr.bf16.mxu0 %v362_v48 }
  0x8b   : > { %2342 = vmatmul.mubr.bf16.gmra.mrb[24].mxu0 %v363_v53 }
  0x8c   : > { %2345 = vmatprep.mubr.bf16.mxu0 %v364_v54 }
  0x93   : > { %2346 = vmatmul.mubr.bf16.gmra.mrb[28].mxu0 %v365_v57 }
 0x12e   : > { %v2319_v61 = vpop.f32.mrb[0].mxu0 }
 0x12f   : > { %v480_v62 = vadd.f32 %v2319_v61, %v2912_v60  ;;  %v471_v63 = vpop.f32.mrb[1].mxu0 }
 0x130   : > { %v472_v0 = vadd.f32 %v2912_v60, %v471_v63  ;;  %v2320_v1 = vpop.f32.mrb[2].mxu0 }
 0x131   : > { %v483_v2 = vadd.f32 %v2320_v1, %v2912_v60  ;;  %v474_v3 = vpop.f32.mrb[3].mxu0  ;;  %v600_v5 = vmax.f32 %v480_v62, 0.0 }
 0x132   : > { %v475_v4 = vadd.f32 %v2912_v60, %v474_v3  ;;  %v598_v7 = vmax.f32 %v472_v0, 0.0 }
 0x133   : > { %v601_v6 = vmax.f32 %v483_v2, 0.0 }
 0x134   : > { %v599_v8 = vmax.f32 %v475_v4, 0.0 }
 0x135   : > { %v631_v9 = vpack.c.bf16 %v601_v6, %v600_v5 }
 0x136   : > { %v630_v10 = vpack.c.bf16 %v599_v8, %v598_v7  ;;  %v2323_v11 = vpop.f32.mrb[4].mxu0 }
 0x137   : > { %v496_v12 = vadd.f32 %v2323_v11, %v2912_v60  ;;  %v487_v13 = vpop.f32.mrb[5].mxu0 }
 0x138   : > { %v488_v14 = vadd.f32 %v2912_v60, %v487_v13  ;;  %v2324_v15 = vpop.f32.mrb[6].mxu0  ;;  %2353 = vmatprep.mubr.msk.bf16.mxu0 %vm662_vm0, %v630_v10 }
 0x139   : > { %v604_v16 = vmax.f32 %v496_v12, 0.0  ;;  %v499_v17 = vadd.f32 %v2324_v15, %v2912_v60  ;;  %v490_v18 = vpop.f32.mrb[7].mxu0  ;;  %2354 = vmatmul.mubr.msk.bf16.vlgmr.msra.gmra.mrb[32].mxu0 %vm662_vm0, %v631_v9 }
 0x13a   : > { %v602_v19 = vmax.f32 %v488_v14, 0.0  ;;  %v491_v20 = vadd.f32 %v2912_v60, %v490_v18 }
 0x13b   : > { %v605_v21 = vmax.f32 %v499_v17, 0.0 }
 0x13c   : > { %v603_v22 = vmax.f32 %v491_v20, 0.0 }
 0x13d   : > { %v633_v23 = vpack.c.bf16 %v605_v21, %v604_v16 }
 0x13e   : > { %v632_v24 = vpack.c.bf16 %v603_v22, %v602_v19  ;;  %v2327_v25 = vpop.f32.mrb[8].mxu0 }
 0x13f   : > { %v512_v26 = vadd.f32 %v2327_v25, %v2912_v60  ;;  %v503_v27 = vpop.f32.mrb[9].mxu0 }
 0x140   : > { %2357 = vmatprep.mubr.msk.bf16.mxu0 %vm662_vm0, %v632_v24  ;;  %v504_v28 = vadd.f32 %v2912_v60, %v503_v27  ;;  %v2328_v29 = vpop.f32.mrb[10].mxu0 }
 0x141   : > { %2358 = vmatmul.mubr.msk.bf16.gmra.mrb[36].mxu0 %vm662_vm0, %v633_v23  ;;  %v608_v30 = vmax.f32 %v512_v26, 0.0  ;;  %v515_v31 = vadd.f32 %v2328_v29, %v2912_v60  ;;  %v506_v32 = vpop.f32.mrb[11].mxu0 }
 0x142   : > { %v606_v33 = vmax.f32 %v504_v28, 0.0  ;;  %v507_v34 = vadd.f32 %v2912_v60, %v506_v32 }
 0x143   : > { %v609_v35 = vmax.f32 %v515_v31, 0.0 }
 0x144   : > { %v607_v36 = vmax.f32 %v507_v34, 0.0 }
 0x145   : > { %v635_v37 = vpack.c.bf16 %v609_v35, %v608_v30 }
 0x146   : > { %v634_v38 = vpack.c.bf16 %v607_v36, %v606_v33  ;;  %v2331_v39 = vpop.f32.mrb[12].mxu0 }
 0x147   : > { %v528_v40 = vadd.f32 %v2331_v39, %v2912_v60  ;;  %v519_v41 = vpop.f32.mrb[13].mxu0 }
 0x148   : > { %2361 = vmatprep.mubr.msk.bf16.mxu1 %vm662_vm0, %v634_v38  ;;  %v520_v42 = vadd.f32 %v2912_v60, %v519_v41  ;;  %v2332_v43 = vpop.f32.mrb[14].mxu0 }
 0x149   : > { %2362 = vmatmul.mubr.msk.bf16.vlgmr.msra.gmra.mrb[0].mxu1 %vm662_vm0, %v635_v37  ;;  %v612_v44 = vmax.f32 %v528_v40, 0.0  ;;  %v531_v45 = vadd.f32 %v2332_v43, %v2912_v60  ;;  %v522_v46 = vpop.f32.mrb[15].mxu0 }
 0x14a   : > { %v610_v47 = vmax.f32 %v520_v42, 0.0  ;;  %v523_v48 = vadd.f32 %v2912_v60, %v522_v46 }
 0x14b   : > { %v613_v49 = vmax.f32 %v531_v45, 0.0 }
 0x14c   : > { %v611_v50 = vmax.f32 %v523_v48, 0.0 }
 0x14d   : > { %v637_v51 = vpack.c.bf16 %v613_v49, %v612_v44 }
 0x14e   : > { %v636_v52 = vpack.c.bf16 %v611_v50, %v610_v47  ;;  %v2335_v53 = vpop.f32.mrb[16].mxu0 }
 0x14f   : > { %v544_v54 = vadd.f32 %v2335_v53, %v2912_v60  ;;  %v535_v55 = vpop.f32.mrb[17].mxu0 }
 0x150   : > { %2365 = vmatprep.mubr.msk.bf16.mxu1 %vm662_vm0, %v636_v52  ;;  %v536_v56 = vadd.f32 %v2912_v60, %v535_v55  ;;  %v2336_v57 = vpop.f32.mrb[18].mxu0 }
 0x151   : > { %2366 = vmatmul.mubr.msk.bf16.gmra.mrb[4].mxu1 %vm662_vm0, %v637_v51  ;;  %v616_v59 = vmax.f32 %v544_v54, 0.0  ;;  %v547_v61 = vadd.f32 %v2336_v57, %v2912_v60  ;;  %v538_v62 = vpop.f32.mrb[19].mxu0 }
 0x152   : > { %v614_v63 = vmax.f32 %v536_v56, 0.0  ;;  %v539_v0 = vadd.f32 %v2912_v60, %v538_v62 }
 0x153   : > { %v617_v1 = vmax.f32 %v547_v61, 0.0 }
 0x154   : > { %v615_v2 = vmax.f32 %v539_v0, 0.0 }
 0x155   : > { %v639_v3 = vpack.c.bf16 %v617_v1, %v616_v59 }
 0x156   : > { %v638_v4 = vpack.c.bf16 %v615_v2, %v614_v63  ;;  %v2339_v5 = vpop.f32.mrb[20].mxu0 }
 0x157   : > { %v560_v6 = vadd.f32 %v2339_v5, %v2912_v60  ;;  %v551_v7 = vpop.f32.mrb[21].mxu0 }
 0x158   : > { %2369 = vmatprep.mubr.msk.bf16.mxu1 %vm662_vm0, %v638_v4  ;;  %v552_v8 = vadd.f32 %v2912_v60, %v551_v7  ;;  %v2340_v9 = vpop.f32.mrb[22].mxu0 }
 0x159   : > { %2370 = vmatmul.mubr.msk.bf16.gmra.mrb[8].mxu1 %vm662_vm0, %v639_v3  ;;  %v620_v10 = vmax.f32 %v560_v6, 0.0  ;;  %v563_v11 = vadd.f32 %v2340_v9, %v2912_v60  ;;  %v554_v12 = vpop.f32.mrb[23].mxu0 }
 0x15a   : > { %v618_v13 = vmax.f32 %v552_v8, 0.0  ;;  %v555_v14 = vadd.f32 %v2912_v60, %v554_v12 }
 0x15b   : > { %v621_v15 = vmax.f32 %v563_v11, 0.0 }
 0x15c   : > { %v619_v16 = vmax.f32 %v555_v14, 0.0 }
 0x15d   : > { %v641_v17 = vpack.c.bf16 %v621_v15, %v620_v10 }
 0x15e   : > { %v640_v18 = vpack.c.bf16 %v619_v16, %v618_v13  ;;  %v2343_v19 = vpop.f32.mrb[24].mxu0  ;;  %v3138_v16 = vpop.permute.xlu1 %1615 }
 0x15f   : > { %v576_v20 = vadd.f32 %v2343_v19, %v2912_v60  ;;  %v567_v21 = vpop.f32.mrb[25].mxu0 }
 0x160   : > { %2373 = vmatprep.mubr.msk.bf16.mxu1 %vm662_vm0, %v640_v18  ;;  %v568_v22 = vadd.f32 %v2912_v60, %v567_v21  ;;  %v2344_v23 = vpop.f32.mrb[26].mxu0 }
 0x161   : > { %2374 = vmatmul.mubr.msk.bf16.gmra.mrb[12].mxu1 %vm662_vm0, %v641_v17  ;;  %v624_v24 = vmax.f32 %v576_v20, 0.0  ;;  %v579_v25 = vadd.f32 %v2344_v23, %v2912_v60  ;;  %v570_v26 = vpop.f32.mrb[27].mxu0  ;;  %v3140_v17 = vpop.permute.xlu0 %2496 }
 0x162   : > { %v622_v27 = vmax.f32 %v568_v22, 0.0  ;;  %v571_v28 = vadd.f32 %v2912_v60, %v570_v26 }
 0x163   : > { %v625_v29 = vmax.f32 %v579_v25, 0.0 }
 0x164   : > { %v623_v30 = vmax.f32 %v571_v28, 0.0 }
 0x165   : > { %v643_v31 = vpack.c.bf16 %v625_v29, %v624_v24 }
 0x166   : > { %v642_v32 = vpack.c.bf16 %v623_v30, %v622_v27  ;;  %v2347_v33 = vpop.f32.mrb[28].mxu0 }
 0x167   : > { %v592_v34 = vadd.f32 %v2347_v33, %v2912_v60  ;;  %v583_v35 = vpop.f32.mrb[29].mxu0 }
 0x168   : > { %2377 = vmatprep.mubr.msk.bf16.mxu1 %vm662_vm0, %v642_v32  ;;  %v584_v36 = vadd.f32 %v2912_v60, %v583_v35  ;;  %v2348_v37 = vpop.f32.mrb[30].mxu0 }
 0x169   : > { %2378 = vmatmul.mubr.msk.bf16.gmra.mrb[16].mxu1 %vm662_vm0, %v643_v31  ;;  %v628_v38 = vmax.f32 %v592_v34, 0.0  ;;  %v595_v39 = vadd.f32 %v2348_v37, %v2912_v60  ;;  %v586_v40 = vpop.f32.mrb[31].mxu0 }
 0x16a   : > { %v626_v41 = vmax.f32 %v584_v36, 0.0  ;;  %v587_v42 = vadd.f32 %v2912_v60, %v586_v40 }
 0x16b   : > { %v629_v43 = vmax.f32 %v595_v39, 0.0 }
 0x16c   : > { %v627_v44 = vmax.f32 %v587_v42, 0.0 }
 0x16d   : > { %v645_v45 = vpack.c.bf16 %v629_v43, %v628_v38 }
 0x16e   : > { %v644_v46 = vpack.c.bf16 %v627_v44, %v626_v41 }
 0x170   : > { %2381 = vmatprep.mubr.msk.bf16.mxu1 %vm662_vm0, %v644_v46 }
 0x171   : > { %2382 = vmatmul.mubr.msk.bf16.gmra.mrb[20].mxu1 %vm662_vm0, %v645_v45 }
 0x20c   : > { %v2962_v47 = vpop.f32.mrb[32].mxu0 }
 0x20d   : > { %1101 = vrot.lane.b32.xlu0 %v2962_v47, %s2672_s19  ;;  %v2966_v48 = vpop.f32.mrb[33].mxu0 }
 0x20e   : > { %1325 = vrot.lane.b32.xlu1 %v2966_v48, %s2671_s22  ;;  %v2970_v60 = vpop.f32.mrb[34].mxu0 }
 0x20f   : > { %v2972_v49 = vpop.f32.mrb[35].mxu0 }
 0x211   : > { %1329 = vrot.lane.b32.xlu0 %v2962_v47, %s2671_s22 }
 0x212   : > { %1331 = vrot.lane.b32.xlu1 %v2970_v60, %s2671_s22 }
 0x214   : > { %v2978_v50 = vpop.f32.mrb[36].mxu0 }
 0x215   : > { %1103 = vrot.lane.b32.xlu0 %v2970_v60, %s2672_s19  ;;  %v2982_v51 = vpop.f32.mrb[37].mxu0 }
 0x216   : > { %1105 = vrot.lane.b32.xlu1 %v2982_v51, %s2672_s19  ;;  %v2986_v52 = vpop.f32.mrb[38].mxu0 }
 0x217   : > { %v2988_v53 = vpop.f32.mrb[39].mxu0 }
 0x219   : > { %1327 = vrot.lane.b32.xlu0 %v2972_v49, %s2671_s22 }
 0x21a   : > { %1111 = vrot.lane.b32.xlu1 %v2986_v52, %s2672_s19 }
 0x21c   : > { %v2994_v54 = vpop.f32.mrb[0].mxu1 }
 0x21d   : > { %1109 = vrot.lane.b32.xlu0 %v2978_v50, %s2672_s19  ;;  %v2998_v55 = vpop.f32.mrb[1].mxu1 }
 0x21e   : > { %1339 = vrot.lane.b32.xlu1 %v2986_v52, %s2671_s22  ;;  %v3002_v56 = vpop.f32.mrb[2].mxu1 }
 0x21f   : > { %v3004_v57 = vpop.f32.mrb[3].mxu1 }
 0x221   : > { %1337 = vrot.lane.b32.xlu0 %v2978_v50, %s2671_s22 }
 0x222   : > { %1107 = vrot.lane.b32.xlu1 %v2988_v53, %s2672_s19 }
 0x224   : > { %v3010_v59 = vpop.f32.mrb[4].mxu1 }
 0x225   : > { %1333 = vrot.lane.b32.xlu0 %v2982_v51, %s2671_s22  ;;  %v3014_v61 = vpop.f32.mrb[5].mxu1 }
 0x226   : > { %1335 = vrot.lane.b32.xlu1 %v2988_v53, %s2671_s22  ;;  %v3018_v62 = vpop.f32.mrb[6].mxu1 }
 0x227   : > { %v3020_v63 = vpop.f32.mrb[7].mxu1 }
 0x229   : > { %1117 = vrot.lane.b32.xlu0 %v2994_v54, %s2672_s19 }
 0x22a   : > { %1119 = vrot.lane.b32.xlu1 %v3002_v56, %s2672_s19 }
 0x22c   : > { %v3026_v0 = vpop.f32.mrb[8].mxu1 }
 0x22d   : > { %1345 = vrot.lane.b32.xlu0 %v2994_v54, %s2671_s22  ;;  %v3030_v1 = vpop.f32.mrb[9].mxu1 }
 0x22e   : > { %1347 = vrot.lane.b32.xlu1 %v3002_v56, %s2671_s22  ;;  %v3034_v2 = vpop.f32.mrb[10].mxu1 }
 0x22f   : > { %v3036_v3 = vpop.f32.mrb[11].mxu1 }
 0x231   : > { %1113 = vrot.lane.b32.xlu0 %v2998_v55, %s2672_s19 }
 0x232   : > { %1115 = vrot.lane.b32.xlu1 %v3004_v57, %s2672_s19 }
 0x234   : > { %v3042_v4 = vpop.f32.mrb[12].mxu1 }
 0x235   : > { %1341 = vrot.lane.b32.xlu0 %v2998_v55, %s2671_s22  ;;  %v3046_v5 = vpop.f32.mrb[13].mxu1 }
 0x236   : > { %1343 = vrot.lane.b32.xlu1 %v3004_v57, %s2671_s22  ;;  %v3050_v6 = vpop.f32.mrb[14].mxu1 }
 0x237   : > { %v3052_v7 = vpop.f32.mrb[15].mxu1 }
 0x239   : > { %1125 = vrot.lane.b32.xlu0 %v3010_v59, %s2672_s19 }
 0x23a   : > { %1127 = vrot.lane.b32.xlu1 %v3018_v62, %s2672_s19 }
 0x23c   : > { %v3058_v8 = vpop.f32.mrb[16].mxu1 }
 0x23d   : > { %1353 = vrot.lane.b32.xlu0 %v3010_v59, %s2671_s22  ;;  %v3062_v9 = vpop.f32.mrb[17].mxu1 }
 0x23e   : > { %1355 = vrot.lane.b32.xlu1 %v3018_v62, %s2671_s22  ;;  %v3066_v10 = vpop.f32.mrb[18].mxu1 }
 0x23f   : > { %v3068_v11 = vpop.f32.mrb[19].mxu1 }
 0x241   : > { %1121 = vrot.lane.b32.xlu0 %v3014_v61, %s2672_s19 }
 0x242   : > { %1123 = vrot.lane.b32.xlu1 %v3020_v63, %s2672_s19 }
 0x244   : > { %v3074_v12 = vpop.f32.mrb[20].mxu1 }
 0x245   : > { %1349 = vrot.lane.b32.xlu0 %v3014_v61, %s2671_s22  ;;  %v3078_v13 = vpop.f32.mrb[21].mxu1 }
 0x246   : > { %1351 = vrot.lane.b32.xlu1 %v3020_v63, %s2671_s22  ;;  %v3082_v14 = vpop.f32.mrb[22].mxu1 }
 0x247   : > { %v3084_v15 = vpop.f32.mrb[23].mxu1 }
 0x249   : > { %1133 = vrot.lane.b32.xlu0 %v3026_v0, %s2672_s19 }
 0x24a   : > { %1135 = vrot.lane.b32.xlu1 %v3034_v2, %s2672_s19 }
 0x24d   : > { %1361 = vrot.lane.b32.xlu0 %v3026_v0, %s2671_s22 }
 0x24e   : > { %1363 = vrot.lane.b32.xlu1 %v3034_v2, %s2671_s22 }
 0x251   : > { %1129 = vrot.lane.b32.xlu0 %v3030_v1, %s2672_s19 }
 0x252   : > { %1131 = vrot.lane.b32.xlu1 %v3036_v3, %s2672_s19 }
 0x255   : > { %1357 = vrot.lane.b32.xlu0 %v3030_v1, %s2671_s22 }
 0x256   : > { %1359 = vrot.lane.b32.xlu1 %v3036_v3, %s2671_s22 }
 0x259   : > { %1141 = vrot.lane.b32.xlu0 %v3042_v4, %s2672_s19 }
 0x25a   : > { %1143 = vrot.lane.b32.xlu1 %v3050_v6, %s2672_s19 }
 0x25d   : > { %1369 = vrot.lane.b32.xlu0 %v3042_v4, %s2671_s22 }
 0x25e   : > { %1371 = vrot.lane.b32.xlu1 %v3050_v6, %s2671_s22 }
 0x261   : > { %1137 = vrot.lane.b32.xlu0 %v3046_v5, %s2672_s19 }
 0x262   : > { %1139 = vrot.lane.b32.xlu1 %v3052_v7, %s2672_s19 }
 0x265   : > { %1365 = vrot.lane.b32.xlu0 %v3046_v5, %s2671_s22 }
 0x266   : > { %1367 = vrot.lane.b32.xlu1 %v3052_v7, %s2671_s22 }
 0x269   : > { %1149 = vrot.lane.b32.xlu0 %v3058_v8, %s2672_s19 }
 0x26a   : > { %1151 = vrot.lane.b32.xlu1 %v3066_v10, %s2672_s19 }
 0x26d   : > { %1377 = vrot.lane.b32.xlu0 %v3058_v8, %s2671_s22 }
 0x26e   : > { %1147 = vrot.lane.b32.xlu1 %v3068_v11, %s2672_s19 }
 0x271   : > { %1145 = vrot.lane.b32.xlu0 %v3062_v9, %s2672_s19 }
 0x272   : > { %1375 = vrot.lane.b32.xlu1 %v3068_v11, %s2671_s22 }
 0x275   : > { %1373 = vrot.lane.b32.xlu0 %v3062_v9, %s2671_s22 }
 0x276   : > { %1159 = vrot.lane.b32.xlu1 %v3082_v14, %s2672_s19 }
 0x279   : > { %1157 = vrot.lane.b32.xlu0 %v3074_v12, %s2672_s19 }
 0x27a   : > { %1155 = vrot.lane.b32.xlu1 %v3084_v15, %s2672_s19 }
 0x27d   : > { %1153 = vrot.lane.b32.xlu0 %v3078_v13, %s2672_s19 }
 0x27f   : > { %v1102_v18 = vpop.permute.xlu0 %1101 }
 0x280   : > { %v3144_v19 = vpop.permute.xlu1 %1325  ;;  %1481 = vrot.lane.b32.xlu1 %v1102_v18, %s2671_s22 }
 0x283   : > { %v3147_v20 = vpop.permute.xlu0 %1329 }
 0x284   : > { %v3149_v21 = vpop.permute.xlu1 %1331 }
 0x287   : > { %v1104_v22 = vpop.permute.xlu0 %1103 }
 0x288   : > { %1483 = vrot.lane.b32.xlu0 %v1104_v22, %s2671_s22  ;;  %v1106_v23 = vpop.permute.xlu1 %1105 }
 0x289   : > { %1485 = vrot.lane.b32.xlu1 %v1106_v23, %s2671_s22 }
 0x28b   : > { %v3153_v24 = vpop.permute.xlu0 %1327 }
 0x28c   : > { %v1112_v25 = vpop.permute.xlu1 %1111 }
 0x28d   : > { %1491 = vrot.lane.b32.xlu1 %v1112_v25, %s2671_s22 }
 0x28f   : > { %v1110_v26 = vpop.permute.xlu0 %1109 }
 0x290   : > { %1489 = vrot.lane.b32.xlu0 %v1110_v26, %s2671_s22  ;;  %v1340_v27 = vpop.permute.xlu1 %1339 }
 0x291   : > { %v3158_v28 = vadd.f32 %v1340_v27, %v3004_v57 }
 0x293   : > { %v1338_v29 = vpop.permute.xlu0 %1337 }
 0x294   : > { %v3161_v30 = vadd.f32 %v1338_v29, %v2998_v55  ;;  %v1108_v31 = vpop.permute.xlu1 %1107 }
 0x295   : > { %1487 = vrot.lane.b32.xlu0 %v1108_v31, %s2671_s22 }
 0x297   : > { %v1334_v32 = vpop.permute.xlu0 %1333 }
 0x298   : > { %v3165_v33 = vadd.f32 %v2978_v50, %v1334_v32  ;;  %v1336_v34 = vpop.permute.xlu1 %1335 }
 0x299   : > { %v3168_v35 = vadd.f32 %v2986_v52, %v1336_v34 }
 0x29b   : > { %v1118_v36 = vpop.permute.xlu0 %1117 }
 0x29c   : > { %1497 = vrot.lane.b32.xlu0 %v1118_v36, %s2671_s22  ;;  %v1120_v37 = vpop.permute.xlu1 %1119 }
 0x29d   : > { %1499 = vrot.lane.b32.xlu1 %v1120_v37, %s2671_s22 }
 0x29f   : > { %v1346_v38 = vpop.permute.xlu0 %1345 }
 0x2a0   : > { %v3173_v39 = vadd.f32 %v1346_v38, %v3014_v61  ;;  %v1348_v40 = vpop.permute.xlu1 %1347 }
 0x2a1   : > { %v3176_v41 = vadd.f32 %v1348_v40, %v3020_v63 }
 0x2a3   : > { %v1114_v42 = vpop.permute.xlu0 %1113 }
 0x2a4   : > { %1493 = vrot.lane.b32.xlu0 %v1114_v42, %s2671_s22  ;;  %v1116_v43 = vpop.permute.xlu1 %1115 }
 0x2a5   : > { %1495 = vrot.lane.b32.xlu1 %v1116_v43, %s2671_s22 }
 0x2a7   : > { %v1342_v44 = vpop.permute.xlu0 %1341 }
 0x2a8   : > { %v3181_v45 = vadd.f32 %v2994_v54, %v1342_v44  ;;  %v1344_v46 = vpop.permute.xlu1 %1343 }
 0x2a9   : > { %v3184_v50 = vadd.f32 %v3002_v56, %v1344_v46 }
 0x2ab   : > { %v1126_v52 = vpop.permute.xlu0 %1125 }
 0x2ac   : > { %1505 = vrot.lane.b32.xlu0 %v1126_v52, %s2671_s22  ;;  %v1128_v55 = vpop.permute.xlu1 %1127 }
 0x2ad   : > { %1507 = vrot.lane.b32.xlu1 %v1128_v55, %s2671_s22 }
 0x2af   : > { %v1354_v57 = vpop.permute.xlu0 %1353 }
 0x2b0   : > { %v3189_v61 = vadd.f32 %v1354_v57, %v3030_v1  ;;  %v1356_v63 = vpop.permute.xlu1 %1355 }
 0x2b1   : > { %v3192_v18 = vadd.f32 %v1356_v63, %v3036_v3 }
 0x2b3   : > { %v1122_v54 = vpop.permute.xlu0 %1121 }
 0x2b4   : > { %1501 = vrot.lane.b32.xlu0 %v1122_v54, %s2671_s22  ;;  %v1124_v22 = vpop.permute.xlu1 %1123 }
 0x2b5   : > { %1503 = vrot.lane.b32.xlu1 %v1124_v22, %s2671_s22 }
 0x2b7   : > { %v1350_v56 = vpop.permute.xlu0 %1349 }
 0x2b8   : > { %v3197_v23 = vadd.f32 %v3010_v59, %v1350_v56  ;;  %v1352_v25 = vpop.permute.xlu1 %1351 }
 0x2b9   : > { %v3200_v26 = vadd.f32 %v3018_v62, %v1352_v25 }
 0x2bb   : > { %v1134_v1 = vpop.permute.xlu0 %1133 }
 0x2bc   : > { %1513 = vrot.lane.b32.xlu0 %v1134_v1, %s2671_s22  ;;  %v1136_v27 = vpop.permute.xlu1 %1135 }
 0x2bd   : > { %1515 = vrot.lane.b32.xlu1 %v1136_v27, %s2671_s22 }
 0x2bf   : > { %v1362_v3 = vpop.permute.xlu0 %1361 }
 0x2c0   : > { %v3205_v29 = vadd.f32 %v1362_v3, %v3046_v5  ;;  %v1364_v31 = vpop.permute.xlu1 %1363 }
 0x2c1   : > { %v3208_v32 = vadd.f32 %v1364_v31, %v3052_v7 }
 0x2c3   : > { %v1130_v59 = vpop.permute.xlu0 %1129 }
 0x2c4   : > { %1509 = vrot.lane.b32.xlu0 %v1130_v59, %s2671_s22  ;;  %v1132_v34 = vpop.permute.xlu1 %1131 }
 0x2c5   : > { %1511 = vrot.lane.b32.xlu1 %v1132_v34, %s2671_s22 }
 0x2c7   : > { %v1358_v62 = vpop.permute.xlu0 %1357 }
 0x2c8   : > { %v3213_v36 = vadd.f32 %v3026_v0, %v1358_v62  ;;  %v1360_v37 = vpop.permute.xlu1 %1359  ;;  %v2550_v62 = vadd.high.f32.bf16 %v2972_v49, %v3140_v17 }
 0x2c9   : > { %v3216_v38 = vadd.f32 %v3034_v2, %v1360_v37 }
 0x2cb   : > { %v1142_v5 = vpop.permute.xlu0 %1141 }
 0x2cc   : > { %1521 = vrot.lane.b32.xlu0 %v1142_v5, %s2671_s22  ;;  %v1144_v40 = vpop.permute.xlu1 %1143 }
 0x2cd   : > { %1523 = vrot.lane.b32.xlu1 %v1144_v40, %s2671_s22 }
 0x2cf   : > { %v1370_v7 = vpop.permute.xlu0 %1369 }
 0x2d0   : > { %v3221_v42 = vadd.f32 %v1370_v7, %v3062_v9  ;;  %v1372_v43 = vpop.permute.xlu1 %1371 }
 0x2d1   : > { %v3224_v44 = vadd.f32 %v1372_v43, %v3068_v11  ;;  %v2516_v43 = vld [vmem:[%s3533_s5 + $0x8] sm:$0xff]  }
 0x2d3   : > { %v1138_v0 = vpop.permute.xlu0 %1137 }
 0x2d4   : > { %1517 = vrot.lane.b32.xlu0 %v1138_v0, %s2671_s22  ;;  %v1140_v46 = vpop.permute.xlu1 %1139  ;;  %v1422_v0 = vadd.f32 %v3149_v21, %v2988_v53 }
 0x2d5   : > { %1519 = vrot.lane.b32.xlu1 %v1140_v46, %s2671_s22 }
 0x2d7   : > { %v1366_v2 = vpop.permute.xlu0 %1365 }
 0x2d8   : > { %v3229_v52 = vadd.f32 %v3042_v4, %v1366_v2  ;;  %v1368_v55 = vpop.permute.xlu1 %1367 }
 0x2d9   : > { %v3232_v57 = vadd.f32 %v3050_v6, %v1368_v55 }
 0x2db   : > { %v1150_v9 = vpop.permute.xlu0 %1149 }
 0x2dc   : > { %1529 = vrot.lane.b32.xlu0 %v1150_v9, %s2671_s22  ;;  %v1152_v63 = vpop.permute.xlu1 %1151  ;;  %v1419_v9 = vadd.f32 %v2962_v47, %v3144_v19 }
 0x2dd   : > { %1531 = vrot.lane.b32.xlu1 %v1152_v63, %s2671_s22 }
 0x2df   : > { %v1378_v11 = vpop.permute.xlu0 %1377 }
 0x2e0   : > { %v3237_v54 = vadd.f32 %v1378_v11, %v3078_v13  ;;  %v1148_v22 = vpop.permute.xlu1 %1147 }
 0x2e1   : > { %1527 = vrot.lane.b32.xlu1 %v1148_v22, %s2671_s22 }
 0x2e3   : > { %v1146_v56 = vpop.permute.xlu0 %1145 }
 0x2e4   : > { %1525 = vrot.lane.b32.xlu0 %v1146_v56, %s2671_s22  ;;  %v1376_v4 = vpop.permute.xlu1 %1375  ;;  %v1420_v56 = vadd.f32 %v2970_v60, %v3153_v24 }
 0x2e5   : > { %v3242_v6 = vadd.f32 %v3066_v10, %v1376_v4  ;;  %1379 = vrot.lane.b32.xlu1 %v3066_v10, %s2671_s22  ;;  %v2515_v10 = vld [vmem:[%s3533_s5] sm:$0xff]  }
 0x2e6   : > { %2385 = vmatprep.subr.bf16.mxu1 %v2515_v10 }
 0x2e7   : > { %v1374_v25 = vpop.permute.xlu0 %1373  ;;  %2386 = vmatpush3.bf16.msra.mxu1 %v2515_v10 }
 0x2e8   : > { %v3247_v1 = vadd.f32 %v3058_v8, %v1374_v25  ;;  %1381 = vrot.lane.b32.xlu0 %v3078_v13, %s2671_s22  ;;  %v1160_v27 = vpop.permute.xlu1 %1159  ;;  %v2549_v8 = vadd.low.f32.bf16 %v2966_v48, %v3140_v17  ;;  %2387 = vmatprep.subr.bf16.mxu1 %v2516_v43  ;;  %v1421_v17 = vadd.f32 %v3147_v20, %v2982_v51 }
 0x2eb   : > { %v1158_v3 = vpop.permute.xlu0 %1157  ;;  %2388 = vmatpush3.bf16.msra.mxu1 %v2516_v43 }
 0x2ec   : > { %v1156_v31 = vpop.permute.xlu1 %1155 }
 0x2ed   : > { %1535 = vrot.lane.b32.xlu1 %v1156_v31, %s2671_s22 }
 0x2ef   : > { %v1154_v59 = vpop.permute.xlu0 %1153 }
 0x2f0   : > { %1533 = vrot.lane.b32.xlu0 %v1154_v59, %s2671_s22 }
 0x2f1   : > { %1383 = vrot.lane.b32.xlu1 %v3084_v15, %s2671_s22 }
 0x2f2   : > { %v1482_v34 = vpop.permute.xlu1 %1481 }
 0x2f3   : > { %v1577_v13 = vadd.f32 %v2549_v8, %v1482_v34 }
 0x2f4   : > { %1537 = vrot.lane.b32.xlu0 %v1158_v3, %s2671_s22 }
 0x2f5   : > { %1539 = vrot.lane.b32.xlu1 %v1160_v27, %s2671_s22  ;;  %v1618_v5 = vadd.f32 %v3138_v16, %v1577_v13 }
 0x2f8   : > { %2501 = vrot.lane.b32.xlu0 %v2670_v58, %s2671_s22  ;;  %v1650_v58 = vmax.f32 %v1618_v5, 0.0  ;;  %s2673_s22 = smov 96  }
 0x2fa   : > { %v1484_v37 = vpop.permute.xlu0 %1483 }
 0x2fb   : > { %v1578_v40 = vadd.f32 %v2550_v62, %v1484_v37  ;;  %v1486_v48 = vpop.permute.xlu1 %1485 }
 0x2fc   : > { %v1579_v53 = vadd.f32 %v1486_v48, %v1419_v9 }
 0x2fd   : > { %v1619_v7 = vadd.f32 %v3138_v16, %v1578_v40 }
 0x2fe   : > { %v1620_v20 = vadd.f32 %v3138_v16, %v1579_v53 }
 0x2ff   : > { %v1651_v46 = vmax.f32 %v1619_v7, 0.0  ;;  %v1492_v2 = vpop.permute.xlu1 %1491 }
 0x300   : > { %v1582_v49 = vadd.f32 %v1492_v2, %v1422_v0  ;;  %v1652_v3 = vmax.f32 %v1620_v20, 0.0 }
 0x301   : > { %v1682_v55 = vpack.c.bf16 %v1651_v46, %v1650_v58 }
 0x302   : > { %v1490_v63 = vpop.permute.xlu0 %1489  ;;  %v1623_v11 = vadd.f32 %v3138_v16, %v1582_v49 }
 0x303   : > { %v1581_v22 = vadd.f32 %v1490_v63, %v1421_v17  ;;  %1725 = vrot.lane.b32.xlu1 %v1682_v55, %s2673_s22 }
 0x304   : > { %v1655_v4 = vmax.f32 %v1623_v11, 0.0 }
 0x305   : > { %v1622_v21 = vadd.f32 %v3138_v16, %v1581_v22 }
 0x307   : > { %v1654_v25 = vmax.f32 %v1622_v21, 0.0  ;;  %v1488_v51 = vpop.permute.xlu0 %1487 }
 0x308   : > { %v1580_v27 = vadd.f32 %v1488_v51, %v1420_v56 }
 0x309   : > { %v1684_v47 = vpack.c.bf16 %v1655_v4, %v1654_v25 }
 0x30a   : > { %v1621_v19 = vadd.f32 %v3138_v16, %v1580_v27 }
 0x30b   : > { %1729 = vrot.lane.b32.xlu1 %v1684_v47, %s2673_s22 }
 0x30c   : > { %v1653_v31 = vmax.f32 %v1621_v19, 0.0 }
 0x30e   : > { %v1498_v59 = vpop.permute.xlu0 %1497  ;;  %v1683_v34 = vpack.c.bf16 %v1653_v31, %v1652_v3 }
 0x30f   : > { %v1585_v8 = vadd.f32 %v1498_v59, %v3161_v30  ;;  %v1500_v10 = vpop.permute.xlu1 %1499 }
 0x310   : > { %v1586_v60 = vadd.f32 %v1500_v10, %v3158_v28  ;;  %1727 = vrot.lane.b32.xlu0 %v1683_v34, %s2673_s22 }
 0x311   : > { %v1626_v24 = vadd.f32 %v3138_v16, %v1585_v8 }
 0x312   : > { %v1627_v13 = vadd.f32 %v3138_v16, %v1586_v60 }
 0x313   : > { %v1658_v62 = vmax.f32 %v1626_v24, 0.0 }
 0x314   : > { %v1659_v37 = vmax.f32 %v1627_v13, 0.0 }
 0x316   : > { %v1494_v5 = vpop.permute.xlu0 %1493  ;;  %v1686_v40 = vpack.c.bf16 %v1659_v37, %v1658_v62 }
 0x317   : > { %v1583_v48 = vadd.f32 %v1494_v5, %v3165_v33  ;;  %v1496_v7 = vpop.permute.xlu1 %1495 }
 0x318   : > { %v1584_v43 = vadd.f32 %v1496_v7, %v3168_v35  ;;  %1733 = vrot.lane.b32.xlu1 %v1686_v40, %s2673_s22 }
 0x319   : > { %v1624_v30 = vadd.f32 %v3138_v16, %v1583_v48 }
 0x31a   : > { %v1625_v28 = vadd.f32 %v3138_v16, %v1584_v43 }
 0x31b   : > { %v1656_v0 = vmax.f32 %v1624_v30, 0.0 }
 0x31c   : > { %v1657_v58 = vmax.f32 %v1625_v28, 0.0 }
 0x31e   : > { %v1506_v46 = vpop.permute.xlu0 %1505  ;;  %v1685_v2 = vpack.c.bf16 %v1657_v58, %v1656_v0 }
 0x31f   : > { %v1589_v49 = vadd.f32 %v1506_v46, %v3173_v39  ;;  %v1508_v17 = vpop.permute.xlu1 %1507 }
 0x320   : > { %v1590_v55 = vadd.f32 %v1508_v17, %v3176_v41  ;;  %1731 = vrot.lane.b32.xlu0 %v1685_v2, %s2673_s22 }
 0x321   : > { %v1630_v33 = vadd.f32 %v3138_v16, %v1589_v49 }
 0x322   : > { %v1631_v35 = vadd.f32 %v3138_v16, %v1590_v55 }
 0x323   : > { %v1662_v9 = vmax.f32 %v1630_v33, 0.0 }
 0x324   : > { %v1663_v63 = vmax.f32 %v1631_v35, 0.0 }
 0x326   : > { %v1688_v11 = vpack.c.bf16 %v1663_v63, %v1662_v9  ;;  %v1502_v22 = vpop.permute.xlu0 %1501 }
 0x327   : > { %v1587_v53 = vadd.f32 %v1502_v22, %v3181_v45  ;;  %v1504_v21 = vpop.permute.xlu1 %1503 }
 0x328   : > { %v1588_v56 = vadd.f32 %v1504_v21, %v3184_v50  ;;  %1737 = vrot.lane.b32.xlu1 %v1688_v11, %s2673_s22 }
 0x329   : > { %v1628_v39 = vadd.f32 %v3138_v16, %v1587_v53 }
 0x32a   : > { %v1629_v41 = vadd.f32 %v3138_v16, %v1588_v56 }
 0x32b   : > { %v1660_v4 = vmax.f32 %v1628_v39, 0.0 }
 0x32c   : > { %v1661_v25 = vmax.f32 %v1629_v41, 0.0 }
 0x32e   : > { %v1687_v51 = vpack.c.bf16 %v1661_v25, %v1660_v4  ;;  %v1514_v20 = vpop.permute.xlu0 %1513 }
 0x32f   : > { %v1593_v27 = vadd.f32 %v1514_v20, %v3189_v61  ;;  %v1516_v47 = vpop.permute.xlu1 %1515 }
 0x330   : > { %v1594_v19 = vadd.f32 %v1516_v47, %v3192_v18  ;;  %1735 = vrot.lane.b32.xlu0 %v1687_v51, %s2673_s22 }
 0x331   : > { %v1634_v45 = vadd.f32 %v3138_v16, %v1593_v27 }
 0x332   : > { %v1635_v50 = vadd.f32 %v3138_v16, %v1594_v19 }
 0x333   : > { %v1666_v3 = vmax.f32 %v1634_v45, 0.0 }
 0x334   : > { %v1667_v31 = vmax.f32 %v1635_v50, 0.0 }
 0x336   : > { %v1690_v59 = vpack.c.bf16 %v1667_v31, %v1666_v3  ;;  %v1510_v34 = vpop.permute.xlu0 %1509 }
 0x337   : > { %v1591_v8 = vadd.f32 %v1510_v34, %v3197_v23  ;;  %v1512_v10 = vpop.permute.xlu1 %1511 }
 0x338   : > { %v1592_v60 = vadd.f32 %v1512_v10, %v3200_v26  ;;  %1741 = vrot.lane.b32.xlu1 %v1690_v59, %s2673_s22 }
 0x339   : > { %v1632_v61 = vadd.f32 %v3138_v16, %v1591_v8 }
 0x33a   : > { %v1633_v18 = vadd.f32 %v3138_v16, %v1592_v60 }
 0x33b   : > { %v1664_v24 = vmax.f32 %v1632_v61, 0.0 }
 0x33c   : > { %v1665_v13 = vmax.f32 %v1633_v18, 0.0 }
 0x33e   : > { %v1689_v62 = vpack.c.bf16 %v1665_v13, %v1664_v24  ;;  %v1522_v37 = vpop.permute.xlu0 %1521 }
 0x33f   : > { %v1597_v5 = vadd.f32 %v1522_v37, %v3205_v29  ;;  %v1524_v40 = vpop.permute.xlu1 %1523 }
 0x340   : > { %v1598_v48 = vadd.f32 %v1524_v40, %v3208_v32  ;;  %1739 = vrot.lane.b32.xlu0 %v1689_v62, %s2673_s22 }
 0x341   : > { %v1638_v23 = vadd.f32 %v3138_v16, %v1597_v5 }
 0x342   : > { %v1639_v26 = vadd.f32 %v3138_v16, %v1598_v48 }
 0x343   : > { %v1670_v7 = vmax.f32 %v1638_v23, 0.0 }
 0x344   : > { %v1671_v43 = vmax.f32 %v1639_v26, 0.0 }
 0x346   : > { %v1692_v30 = vpack.c.bf16 %v1671_v43, %v1670_v7  ;;  %v1518_v28 = vpop.permute.xlu0 %1517 }
 0x347   : > { %v1595_v0 = vadd.f32 %v1518_v28, %v3213_v36  ;;  %v1520_v58 = vpop.permute.xlu1 %1519 }
 0x348   : > { %v1596_v46 = vadd.f32 %v1520_v58, %v3216_v38  ;;  %1745 = vrot.lane.b32.xlu1 %v1692_v30, %s2673_s22 }
 0x349   : > { %v1636_v29 = vadd.f32 %v3138_v16, %v1595_v0 }
 0x34a   : > { %v1637_v32 = vadd.f32 %v3138_v16, %v1596_v46 }
 0x34b   : > { %v1668_v2 = vmax.f32 %v1636_v29, 0.0 }
 0x34c   : > { %v1669_v49 = vmax.f32 %v1637_v32, 0.0 }
 0x34e   : > { %v1691_v17 = vpack.c.bf16 %v1669_v49, %v1668_v2  ;;  %v1530_v55 = vpop.permute.xlu0 %1529 }
 0x34f   : > { %v1601_v33 = vadd.f32 %v1530_v55, %v3221_v42  ;;  %v1532_v35 = vpop.permute.xlu1 %1531 }
 0x350   : > { %v1602_v9 = vadd.f32 %v1532_v35, %v3224_v44  ;;  %1743 = vrot.lane.b32.xlu0 %v1691_v17, %s2673_s22  ;;  %v3370_v35 = vld [vmem:[%s3534_s6] ss:$0 sm:$0xff] }
 0x351   : > { %v1642_v36 = vadd.f32 %v3138_v16, %v1601_v33 }
 0x352   : > { %v1643_v38 = vadd.f32 %v3138_v16, %v1602_v9 }
 0x353   : > { %v1674_v63 = vmax.f32 %v1642_v36, 0.0  ;;  %v1528_v11 = vpop.permute.xlu1 %1527 }
 0x354   : > { %v1675_v22 = vmax.f32 %v1643_v38, 0.0  ;;  %v1600_v53 = vadd.f32 %v1528_v11, %v3232_v57 }
 0x356   : > { %v1694_v21 = vpack.c.bf16 %v1675_v22, %v1674_v63  ;;  %v1526_v56 = vpop.permute.xlu0 %1525  ;;  %v1641_v39 = vadd.f32 %v3138_v16, %v1600_v53  ;;  %v2517_v22 = vld [vmem:[%s2835_s23 + $0x10] sm:$0xff] }
 0x357   : > { %v1599_v42 = vadd.f32 %v1526_v56, %v3229_v52  ;;  %v1380_v25 = vpop.permute.xlu1 %1379 }
 0x358   : > { %1749 = vrot.lane.b32.xlu1 %v1694_v21, %s2673_s22  ;;  %v1673_v41 = vmax.f32 %v1641_v39, 0.0  ;;  %v1446_v3 = vadd.f32 %v1380_v25, %v3084_v15  ;;  %v2518_v39 = vld [vmem:[%s2835_s23] sm:$0xff] }
 0x359   : > { %v1640_v44 = vadd.f32 %v3138_v16, %v1599_v42 }
 0x35a   : > { %v1382_v20 = vpop.permute.xlu0 %1381 }
 0x35b   : > { %v1672_v4 = vmax.f32 %v1640_v44, 0.0  ;;  %v1447_v18 = vadd.f32 %v3074_v12, %v1382_v20  ;;  %v2520_v20 = vld [vmem:[%s2835_s23 + $0x8] sm:$0xff] }
 0x35d   : > { %v1693_v51 = vpack.c.bf16 %v1673_v41, %v1672_v4  ;;  %v2519_v4 = vld [vmem:[%s2835_s23 + $0x18] sm:$0xff] }
 0x35f   : > { %1747 = vrot.lane.b32.xlu0 %v1693_v51, %s2673_s22  ;;  %v1536_v27 = vpop.permute.xlu1 %1535 }
 0x360   : > { %v1604_v57 = vadd.f32 %v1536_v27, %v3242_v6 }
 0x362   : > { %v1534_v47 = vpop.permute.xlu0 %1533  ;;  %v1645_v19 = vadd.f32 %v3138_v16, %v1604_v57 }
 0x363   : > { %v1603_v45 = vadd.f32 %v1534_v47, %v3247_v1  ;;  %v1384_v52 = vpop.permute.xlu1 %1383 }
 0x364   : > { %v1677_v59 = vmax.f32 %v1645_v19, 0.0  ;;  %v1448_v13 = vadd.f32 %v3082_v14, %v1384_v52 }
 0x365   : > { %v1644_v50 = vadd.f32 %v3138_v16, %v1603_v45 }
 0x366   : > { %v1538_v31 = vpop.permute.xlu0 %1537 }
 0x367   : > { %v1676_v34 = vmax.f32 %v1644_v50, 0.0  ;;  %v1605_v8 = vadd.f32 %v1538_v31, %v3237_v54  ;;  %v1540_v10 = vpop.permute.xlu1 %1539  ;;  %v2521_v31 = vld [vmem:[%s2835_s23 + $0x30] sm:$0xff] }
 0x368   : > { %v1606_v60 = vadd.f32 %v1540_v10, %v1446_v3  ;;  %v2522_v10 = vld [vmem:[%s2835_s23 + $0x20] sm:$0xff] }
 0x369   : > { %v1695_v61 = vpack.c.bf16 %v1677_v59, %v1676_v34  ;;  %v1646_v6 = vadd.f32 %v3138_v16, %v1605_v8 }
 0x36a   : > { %v1647_v24 = vadd.f32 %v3138_v16, %v1606_v60  ;;  %v2502_v1 = vpop.permute.xlu0 %2501 }
 0x36b   : > { %v1678_v62 = vmax.f32 %v1646_v6, 0.0  ;;  %1751 = vrot.lane.b32.xlu0 %v1695_v61, %s2673_s22  ;;  %v2551_v37 = vadd.low.f32.bf16 %v1447_v18, %v2502_v1  ;;  %v2552_v5 = vadd.high.f32.bf16 %v1448_v13, %v2502_v1  ;;  %v2523_v18 = vld [vmem:[%s2835_s23 + $0x38] sm:$0xff]  ;;  %v2524_v13 = vld [vmem:[%s2835_s23 + $0x28] sm:$0xff] }
 0x36c   : > { %v1679_v15 = vmax.f32 %v1647_v24, 0.0 }
 0x36d   : > { %v1648_v54 = vadd.f32 %v2551_v37, %v3138_v16  ;;  %v1649_v48 = vadd.f32 %v2552_v5, %v3138_v16 }
 0x36e   : > { %v1696_v40 = vpack.c.bf16 %v1679_v15, %v1678_v62 }
 0x36f   : > { %v1680_v23 = vmax.f32 %v1648_v54, 0.0  ;;  %v1681_v12 = vmax.f32 %v1649_v48, 0.0 }
 0x370   : > { %1753 = vrot.lane.b32.xlu1 %v1696_v40, %s2673_s22 }
 0x371   : > { %v1697_v26 = vpack.c.bf16 %v1681_v12, %v1680_v23  ;;  %v2525_v12 = vld [vmem:[%s2835_s23 + $0x50] sm:$0xff] }
 0x373   : > { %1755 = vrot.lane.b32.xlu0 %v1697_v26, %s2673_s22 }
 0x375   : > { %v1726_v7 = vpop.permute.xlu1 %1725 }
 0x376   : > { %2389 = vmatprep.mubr.msk.bf16.mxu1 %vm662_vm0, %v1726_v7 }
 0x37d   : > { %v1730_v43 = vpop.permute.xlu1 %1729 }
 0x382   : > { %v1728_v14 = vpop.permute.xlu0 %1727 }
 0x383   : > { %2390 = vmatmul.mubr.msk.bf16.vlgmr.msra.gmra.mrb[24].mxu1 %vm662_vm0, %v1728_v14 }
 0x384   : > { %2393 = vmatprep.mubr.msk.bf16.mxu1 %vm662_vm0, %v1730_v43  ;;  %v2526_v43 = vld [vmem:[%s2835_s23 + $0x40] sm:$0xff] }
 0x38a   : > { %v1734_v28 = vpop.permute.xlu1 %1733 }
 0x392   : > { %v1732_v30 = vpop.permute.xlu0 %1731 }
 0x393   : > { %2394 = vmatmul.mubr.msk.bf16.gmra.mrb[28].mxu1 %vm662_vm0, %v1732_v30 }
 0x394   : > { %2397 = vmatprep.mubr.msk.bf16.mxu1 %vm662_vm0, %v1734_v28 }
 0x39a   : > { %v1738_v0 = vpop.permute.xlu1 %1737 }
 0x3a2   : > { %v1736_v16 = vpop.permute.xlu0 %1735 }
 0x3a3   : > { %2398 = vmatmul.mubr.msk.bf16.gmra.mrb[32].mxu1 %vm662_vm0, %v1736_v16 }
 0x3a4   : > { %2401 = vmatprep.mubr.msk.bf16.mxu1 %vm662_vm0, %v1738_v0  ;;  %v2527_v0 = vld [vmem:[%s2835_s23 + $0x58] sm:$0xff] }
 0x3aa   : > { %v1742_v46 = vpop.permute.xlu1 %1741 }
 0x3b2   : > { %v1740_v58 = vpop.permute.xlu0 %1739 }
 0x3b3   : > { %2402 = vmatmul.mubr.msk.bf16.gmra.mrb[36].mxu1 %vm662_vm0, %v1740_v58 }
 0x3b4   : > { %2405 = vmatprep.mubr.msk.bf16.mxu1 %vm662_vm0, %v1742_v46 }
 0x3ba   : > { %v1746_v32 = vpop.permute.xlu1 %1745 }
 0x3c2   : > { %v1744_v29 = vpop.permute.xlu0 %1743 }
 0x3c3   : > { %2406 = vmatmul.mubr.msk.bf16.gmra.mrb[40].mxu1 %vm662_vm0, %v1744_v29  ;;  %v2528_v29 = vld [vmem:[%s2835_s23 + $0x48] sm:$0xff] }
 0x3c4   : > { %2409 = vmatprep.mubr.msk.bf16.mxu1 %vm662_vm0, %v1746_v32 }
 0x3ca   : > { %v1750_v49 = vpop.permute.xlu1 %1749 }
 0x3d1   : > { %v1748_v2 = vpop.permute.xlu0 %1747 }
 0x3d2   : > { %2410 = vmatmul.mubr.msk.bf16.gmra.mrb[44].mxu1 %vm662_vm0, %v1748_v2 }
 0x3d3   : > { %2413 = vmatprep.mubr.msk.bf16.mxu1 %vm662_vm0, %v1750_v49 }
 0x3dd   : > { %v1752_v17 = vpop.permute.xlu0 %1751 }
 0x3de   : > { %2414 = vmatmul.mubr.msk.bf16.gmra.mrb[48].mxu1 %vm662_vm0, %v1752_v17 }
 0x3e2   : > { %v1754_v55 = vpop.permute.xlu1 %1753 }
 0x3e3   : > { %2417 = vmatprep.mubr.msk.bf16.mxu1 %vm662_vm0, %v1754_v55 }
 0x3e5   : > { %v1756_v33 = vpop.permute.xlu0 %1755 }
 0x3e6   : > { %2418 = vmatmul.mubr.msk.bf16.gmra.mrb[52].mxu1 %vm662_vm0, %v1756_v33 }
 0x456   : > { %v2391_v9 = vpop.f32.mrb[24].mxu1 }
 0x457   : > { %v1860_v36 = vadd.f32 %v2391_v9, %v3370_v35  ;;  %v1851_v38 = vpop.f32.mrb[25].mxu1 }
 0x458   : > { %v1852_v63 = vadd.f32 %v3370_v35, %v1851_v38  ;;  %v2392_v11 = vpop.f32.mrb[26].mxu1  ;;  %v2529_v38 = vld [vmem:[%s2835_s23 + $0x70] sm:$0xff] }
 0x459   : > { %v1980_v53 = vadd.f32 %v2517_v22, %v1860_v36  ;;  %v1863_v21 = vadd.f32 %v2392_v11, %v3370_v35  ;;  %v1854_v56 = vpop.f32.mrb[27].mxu1 }
 0x45a   : > { %v1978_v42 = vadd.f32 %v2518_v39, %v1852_v63  ;;  %v1855_v44 = vadd.f32 %v3370_v35, %v1854_v56 }
 0x45b   : > { %v2012_v41 = vmax.f32 %v1980_v53, 0.0  ;;  %v1981_v25 = vadd.f32 %v2519_v4, %v1863_v21  ;;  %v2530_v53 = vld [vmem:[%s2835_s23 + $0x60] sm:$0xff]  ;;  %v2532_v4 = vld [vmem:[%s2835_s23 + $0x68] sm:$0xff] }
 0x45c   : > { %v2010_v51 = vmax.f32 %v1978_v42, 0.0  ;;  %v1979_v27 = vadd.f32 %v2520_v20, %v1855_v44  ;;  %v2531_v42 = vld [vmem:[%s2835_s23 + $0x78] sm:$0xff] }
 0x45d   : > { %2044 = vst [vmem:[%s3382_s10 + $0x10] sm:$0xff] %v2012_v41  ;;  %v2013_v57 = vmax.f32 %v1981_v25, 0.0 }
 0x45e   : > { %2042 = vst [vmem:[%s3382_s10] sm:$0xff] %v2010_v51  ;;  %v2011_v47 = vmax.f32 %v1979_v27, 0.0 }
 0x45f   : > { %2045 = vst [vmem:[%s3382_s10 + $0x18] sm:$0xff] %v2013_v57 }
 0x460   : > { %2043 = vst [vmem:[%s3382_s10 + $0x8] sm:$0xff] %v2011_v47 }
 0x466   : > { %v2395_v19 = vpop.f32.mrb[28].mxu1 }
 0x467   : > { %v1876_v45 = vadd.f32 %v2395_v19, %v3370_v35  ;;  %v1867_v52 = vpop.f32.mrb[29].mxu1 }
 0x468   : > { %v1868_v50 = vadd.f32 %v3370_v35, %v1867_v52  ;;  %v2396_v3 = vpop.f32.mrb[30].mxu1  ;;  %v2533_v52 = vld [vmem:[%s2835_s23 + $0x90] sm:$0xff] }
 0x469   : > { %v1984_v59 = vadd.f32 %v2521_v31, %v1876_v45  ;;  %v1879_v34 = vadd.f32 %v2396_v3, %v3370_v35  ;;  %v1870_v8 = vpop.f32.mrb[31].mxu1 }
 0x46a   : > { %v1982_v60 = vadd.f32 %v2522_v10, %v1868_v50  ;;  %v1871_v61 = vadd.f32 %v3370_v35, %v1870_v8 }
 0x46b   : > { %v2016_v6 = vmax.f32 %v1984_v59, 0.0  ;;  %v1985_v24 = vadd.f32 %v2523_v18, %v1879_v34  ;;  %v2534_v59 = vld [vmem:[%s2835_s23 + $0x80] sm:$0xff]  ;;  %v2536_v18 = vld [vmem:[%s2835_s23 + $0x88] sm:$0xff] }
 0x46c   : > { %v2014_v1 = vmax.f32 %v1982_v60, 0.0  ;;  %v1983_v62 = vadd.f32 %v2524_v13, %v1871_v61  ;;  %v2535_v60 = vld [vmem:[%s2835_s23 + $0x98] sm:$0xff] }
 0x46d   : > { %2048 = vst [vmem:[%s3382_s10 + $0x30] sm:$0xff] %v2016_v6  ;;  %v2017_v15 = vmax.f32 %v1985_v24, 0.0 }
 0x46e   : > { %2046 = vst [vmem:[%s3382_s10 + $0x20] sm:$0xff] %v2014_v1  ;;  %v2015_v37 = vmax.f32 %v1983_v62, 0.0 }
 0x46f   : > { %2049 = vst [vmem:[%s3382_s10 + $0x38] sm:$0xff] %v2017_v15 }
 0x470   : > { %2047 = vst [vmem:[%s3382_s10 + $0x28] sm:$0xff] %v2015_v37 }
 0x476   : > { %v2399_v5 = vpop.f32.mrb[32].mxu1 }
 0x477   : > { %v1892_v40 = vadd.f32 %v2399_v5, %v3370_v35  ;;  %v1883_v54 = vpop.f32.mrb[33].mxu1 }
 0x478   : > { %v1884_v48 = vadd.f32 %v3370_v35, %v1883_v54  ;;  %v2400_v23 = vpop.f32.mrb[34].mxu1  ;;  %v2537_v54 = vld [vmem:[%s2835_s23 + $0xb0] sm:$0xff] }
 0x479   : > { %v1988_v26 = vadd.f32 %v2525_v12, %v1892_v40  ;;  %v1895_v7 = vadd.f32 %v2400_v23, %v3370_v35  ;;  %v1886_v14 = vpop.f32.mrb[35].mxu1 }
 0x47a   : > { %v1986_v30 = vadd.f32 %v2526_v43, %v1884_v48  ;;  %v1887_v28 = vadd.f32 %v3370_v35, %v1886_v14 }
 0x47b   : > { %v2020_v16 = vmax.f32 %v1988_v26, 0.0  ;;  %v1989_v58 = vadd.f32 %v2527_v0, %v1895_v7  ;;  %v2538_v26 = vld [vmem:[%s2835_s23 + $0xa0] sm:$0xff]  ;;  %v2540_v0 = vld [vmem:[%s2835_s23 + $0xa8] sm:$0xff] }
 0x47c   : > { %v2018_v46 = vmax.f32 %v1986_v30, 0.0  ;;  %v1987_v32 = vadd.f32 %v2528_v29, %v1887_v28  ;;  %v2539_v30 = vld [vmem:[%s2835_s23 + $0xb8] sm:$0xff] }
 0x47d   : > { %2052 = vst [vmem:[%s3382_s10 + $0x50] sm:$0xff] %v2020_v16  ;;  %v2021_v2 = vmax.f32 %v1989_v58, 0.0 }
 0x47e   : > { %2050 = vst [vmem:[%s3382_s10 + $0x40] sm:$0xff] %v2018_v46  ;;  %v2019_v49 = vmax.f32 %v1987_v32, 0.0 }
 0x47f   : > { %2053 = vst [vmem:[%s3382_s10 + $0x58] sm:$0xff] %v2021_v2 }
 0x480   : > { %2051 = vst [vmem:[%s3382_s10 + $0x48] sm:$0xff] %v2019_v49 }
 0x486   : > { %v2403_v17 = vpop.f32.mrb[36].mxu1 }
 0x487   : > { %v1908_v55 = vadd.f32 %v2403_v17, %v3370_v35  ;;  %v1899_v33 = vpop.f32.mrb[37].mxu1 }
 0x488   : > { %v1900_v9 = vadd.f32 %v3370_v35, %v1899_v33  ;;  %v2404_v36 = vpop.f32.mrb[38].mxu1  ;;  %v2541_v33 = vld [vmem:[%s2835_s23 + $0xd0] sm:$0xff] }
 0x489   : > { %v1992_v63 = vadd.f32 %v2529_v38, %v1908_v55  ;;  %v1911_v11 = vadd.f32 %v2404_v36, %v3370_v35  ;;  %v1902_v22 = vpop.f32.mrb[39].mxu1 }
 0x48a   : > { %v1990_v21 = vadd.f32 %v2530_v53, %v1900_v9  ;;  %v1903_v56 = vadd.f32 %v3370_v35, %v1902_v22 }
 0x48b   : > { %v2024_v39 = vmax.f32 %v1992_v63, 0.0  ;;  %v1993_v44 = vadd.f32 %v2531_v42, %v1911_v11  ;;  %v2542_v63 = vld [vmem:[%s2835_s23 + $0xc0] sm:$0xff]  ;;  %v2544_v42 = vld [vmem:[%s2835_s23 + $0xc8] sm:$0xff] }
 0x48c   : > { %v2022_v41 = vmax.f32 %v1990_v21, 0.0  ;;  %v1991_v25 = vadd.f32 %v2532_v4, %v1903_v56  ;;  %v2543_v21 = vld [vmem:[%s2835_s23 + $0xd8] sm:$0xff] }
 0x48d   : > { %2056 = vst [vmem:[%s3382_s10 + $0x70] sm:$0xff] %v2024_v39  ;;  %v2025_v51 = vmax.f32 %v1993_v44, 0.0 }
 0x48e   : > { %2054 = vst [vmem:[%s3382_s10 + $0x60] sm:$0xff] %v2022_v41  ;;  %v2023_v20 = vmax.f32 %v1991_v25, 0.0 }
 0x48f   : > { %2057 = vst [vmem:[%s3382_s10 + $0x78] sm:$0xff] %v2025_v51 }
 0x490   : > { %2055 = vst [vmem:[%s3382_s10 + $0x68] sm:$0xff] %v2023_v20 }
 0x496   : > { %v2407_v27 = vpop.f32.mrb[40].mxu1 }
 0x497   : > { %v1924_v57 = vadd.f32 %v2407_v27, %v3370_v35  ;;  %v1915_v47 = vpop.f32.mrb[41].mxu1 }
 0x498   : > { %v1916_v19 = vadd.f32 %v3370_v35, %v1915_v47  ;;  %v2408_v45 = vpop.f32.mrb[42].mxu1  ;;  %v2545_v47 = vld [vmem:[%s2835_s23 + $0xf0] sm:$0xff] }
 0x499   : > { %v1996_v50 = vadd.f32 %v2533_v52, %v1924_v57  ;;  %v1927_v3 = vadd.f32 %v2408_v45, %v3370_v35  ;;  %v1918_v31 = vpop.f32.mrb[43].mxu1 }
 0x49a   : > { %v1994_v34 = vadd.f32 %v2534_v59, %v1916_v19  ;;  %v1919_v8 = vadd.f32 %v3370_v35, %v1918_v31 }
 0x49b   : > { %v2028_v10 = vmax.f32 %v1996_v50, 0.0  ;;  %v1997_v61 = vadd.f32 %v2535_v60, %v1927_v3  ;;  %v2546_v50 = vld [vmem:[%s2835_s23 + $0xe0] sm:$0xff]  ;;  %v2548_v60 = vld [vmem:[%s2835_s23 + $0xe8] sm:$0xff] }
 0x49c   : > { %v2026_v6 = vmax.f32 %v1994_v34, 0.0  ;;  %v1995_v24 = vadd.f32 %v2536_v18, %v1919_v8  ;;  %v2547_v34 = vld [vmem:[%s2835_s23 + $0xf8] sm:$0xff]  ;;  %s2674_s23 = smov [#allocation5]  }
 0x49d   : > { %2060 = vst [vmem:[%s3382_s10 + $0x90] sm:$0xff] %v2028_v10  ;;  %v2029_v1 = vmax.f32 %v1997_v61, 0.0  ;;  %s2587_s17 = sshll.u32 %s2674_s23, 4  ;;  %s2588_s17 = int_to_ptr.vmem [resolvable:$false] %s2587_s17 }
 0x49e   : > { %2058 = vst [vmem:[%s3382_s10 + $0x80] sm:$0xff] %v2026_v6  ;;  %v2027_v13 = vmax.f32 %v1995_v24, 0.0  ;;  %s2589_s22 = scalar_lea.vmem %s2588_s17, 8192  ;;  %p2590_p6 = scmp.lt.s32.totalorder %s3476_s18, %s2588_s17 }
 0x49f   : > { %2061 = vst [vmem:[%s3382_s10 + $0x98] sm:$0xff] %v2029_v1  ;;  %p2591_p13 = scmp.lt.s32.totalorder %s2589_s22, %s2583_s11 }
 0x4a0   : > { %2059 = vst [vmem:[%s3382_s10 + $0x88] sm:$0xff] %v2027_v13 }
 0x4a1   : > { %p2592_p2 = por %p2591_p13, %p2590_p6 }
 0x4a3   : > { %p2593_p5 = pnand %p2592_p2, %p2586_p0 }
 0x4a5   : > { %v2411_v62 = vpop.f32.mrb[44].mxu1 }
 0x4a6   : > { %v1940_v15 = vadd.f32 %v2411_v62, %v3370_v35  ;;  %v1931_v37 = vpop.f32.mrb[45].mxu1 }
 0x4a7   : > { %v1932_v5 = vadd.f32 %v3370_v35, %v1931_v37  ;;  %v2412_v40 = vpop.f32.mrb[46].mxu1 }
 0x4a8   : > { %v2000_v48 = vadd.f32 %v2537_v54, %v1940_v15  ;;  %v1943_v23 = vadd.f32 %v2412_v40, %v3370_v35  ;;  %v1934_v12 = vpop.f32.mrb[47].mxu1 }
 0x4a9   : > { %v1998_v7 = vadd.f32 %v2538_v26, %v1932_v5  ;;  %v1935_v14 = vadd.f32 %v3370_v35, %v1934_v12 }
 0x4aa   : > { %v2032_v43 = vmax.f32 %v2000_v48, 0.0  ;;  %v2001_v28 = vadd.f32 %v2539_v30, %v1943_v23 }
 0x4ab   : > { %v2030_v16 = vmax.f32 %v1998_v7, 0.0  ;;  %v1999_v58 = vadd.f32 %v2540_v0, %v1935_v14 }
 0x4ac   : > { %2064 = vst [vmem:[%s3382_s10 + $0xb0] sm:$0xff] %v2032_v43  ;;  %v2033_v46 = vmax.f32 %v2001_v28, 0.0 }
 0x4ad   : > { %2062 = vst [vmem:[%s3382_s10 + $0xa0] sm:$0xff] %v2030_v16  ;;  %v2031_v29 = vmax.f32 %v1999_v58, 0.0 }
 0x4ae   : > { %2065 = vst [vmem:[%s3382_s10 + $0xb8] sm:$0xff] %v2033_v46 }
 0x4af   : > { %2063 = vst [vmem:[%s3382_s10 + $0xa8] sm:$0xff] %v2031_v29 }
 0x4b1   : > { %v2415_v32 = vpop.f32.mrb[48].mxu1 }
 0x4b2   : > { %v1956_v2 = vadd.f32 %v2415_v32, %v3370_v35  ;;  %v1947_v49 = vpop.f32.mrb[49].mxu1 }
 0x4b3   : > { %v1948_v17 = vadd.f32 %v3370_v35, %v1947_v49  ;;  %v2416_v55 = vpop.f32.mrb[50].mxu1 }
 0x4b4   : > { %v2004_v9 = vadd.f32 %v2541_v33, %v1956_v2  ;;  %v1959_v36 = vadd.f32 %v2416_v55, %v3370_v35  ;;  %v1950_v38 = vpop.f32.mrb[51].mxu1 }
 0x4b5   : > { %v2002_v11 = vadd.f32 %v2542_v63, %v1948_v17  ;;  %v1951_v22 = vadd.f32 %v3370_v35, %v1950_v38 }
 0x4b6   : > { %v2036_v53 = vmax.f32 %v2004_v9, 0.0  ;;  %v2005_v56 = vadd.f32 %v2543_v21, %v1959_v36 }
 0x4b7   : > { %v2034_v39 = vmax.f32 %v2002_v11, 0.0  ;;  %v2003_v44 = vadd.f32 %v2544_v42, %v1951_v22 }
 0x4b8   : > { %2068 = vst [vmem:[%s3382_s10 + $0xd0] sm:$0xff] %v2036_v53  ;;  %v2037_v41 = vmax.f32 %v2005_v56, 0.0 }
 0x4b9   : > { %2066 = vst [vmem:[%s3382_s10 + $0xc0] sm:$0xff] %v2034_v39  ;;  %v2035_v4 = vmax.f32 %v2003_v44, 0.0  ;;  %v2419_v25 = vpop.f32.mrb[52].mxu1 }
 0x4ba   : > { %2069 = vst [vmem:[%s3382_s10 + $0xd8] sm:$0xff] %v2037_v41  ;;  %v1972_v51 = vadd.f32 %v2419_v25, %v3370_v35  ;;  %v1963_v20 = vpop.f32.mrb[53].mxu1 }
 0x4bb   : > { %2067 = vst [vmem:[%s3382_s10 + $0xc8] sm:$0xff] %v2035_v4  ;;  %v1964_v27 = vadd.f32 %v3370_v35, %v1963_v20  ;;  %v2420_v57 = vpop.f32.mrb[54].mxu1 }
 0x4bc   : > { %v2008_v19 = vadd.f32 %v2545_v47, %v1972_v51  ;;  %v1975_v45 = vadd.f32 %v2420_v57, %v3370_v35  ;;  %v1966_v52 = vpop.f32.mrb[55].mxu1 }
 0x4bd   : > { %v2006_v3 = vadd.f32 %v2546_v50, %v1964_v27  ;;  %v1967_v31 = vadd.f32 %v3370_v35, %v1966_v52 }
 0x4be   : > { %v2040_v59 = vmax.f32 %v2008_v19, 0.0  ;;  %v2009_v8 = vadd.f32 %v2547_v34, %v1975_v45 }
 0x4bf   : > { %v2038_v10 = vmax.f32 %v2006_v3, 0.0  ;;  %v2007_v61 = vadd.f32 %v2548_v60, %v1967_v31 }
 0x4c0   : > { %2072 = vst [vmem:[%s3382_s10 + $0xf0] sm:$0xff] %v2040_v59  ;;  %v2041_v6 = vmax.f32 %v2009_v8, 0.0 }
 0x4c1   : > { %2070 = vst [vmem:[%s3382_s10 + $0xe0] sm:$0xff] %v2038_v10  ;;  %v2039_v35 = vmax.f32 %v2007_v61, 0.0 }
 0x4c2   : > { %2073 = vst [vmem:[%s3382_s10 + $0xf8] sm:$0xff] %v2041_v6 }
 0x4c3   : > { %2071 = vst [vmem:[%s3382_s10 + $0xe8] sm:$0xff] %v2039_v35 }
 0x4c4   : > { %2596 = shalt.err (!%p2593_p5)
}
 0x4c5   : > { %s2597_s30 = scalar_lea.hbm %s3474_s12, 4096  ;;  %s2601_s21 = scalar_lea.hbm %s3535_s7, 8192 }
 0x4c6   : > { %p2598_p4 = scmp.ne.s32.totalorder %s3474_s12, %s2597_s30  ;;  %p2602_p12 = scmp.lt.u32.totalorder %s3474_s12, %s3535_s7 }
 0x4c7   : > { %p2603_p1 = scmp.lt.u32.totalorder %s2601_s21, %s2597_s30  ;;  %p2605_p8 = scmp.lt.u32.totalorder %s2597_s30, %s3474_s12 }
 0x4c8   : > { %p2599_p7 = pnand %p2598_p4, %p3543_p9 }
 0x4c9   : > { %p2604_p3 = por %p2603_p1, %p2602_p12 }
 0x4ca   : > { %p2600_p10 = pneg %p2599_p7 }
 0x4cb   : > { %p2606_p11 = por %p2605_p8, %p2604_p3 }
 0x4cd   : > { %p2607_p0 = pnand %p2606_p11, %p2600_p10 }
 0x4cf   : > { %2610 = shalt.err (!%p2607_p0)
}
 0x4d0   : > { %s2675_s11 = smov 128   ;;  %s2676_s23 = smov 8  }
 0x4d1   : > { %2427 = dma.vmem_to_hbm [thread:$0]  (%p3543_p9), %s3476_s18, 4096, %s3474_s12, %s2075_s27, %s2675_s11, %s2675_s11, %s2676_s23  }
 0x4d2 PF: > { %s2105_s17 = sand.u32 1, %s2645_s24   ;;  %p3544_p6 = scmp.ne.s32.totalorder %s3540_s16, 0 }
 0x4d3   : > { %p3545_p13 = scmp.ge.s32.totalorder %s2665_s29, 2  ;;  %s2106_s22 = scalar_lea.sflag [#allocation4], %s2105_s17 }
 0x4d5   : > { %p2434_p2 = pnand %p3545_p13, %p3544_p6 }
 0x4d7   : > { %2640 = dma.done.wait (!%p2434_p2), %s2106_s22, 4096  }
 0x4d8   : > { %2642 = vsyncadd (!%p2434_p2), %s2106_s22, 4294963200  ;;  %s23_s29 = sadd.s32 1, %s2665_s29   ;;  %s3546_s24 = smov %s2649_s25 }
 0x4d9   : > { %p20_p5 = scmp.ge.s32.totalorder %s23_s29, 4   ;;  %s3547_s25 = smov %s2653_s26 }
 0x4da   : > { %s3548_s26 = smov %s2773_s15  ;;  %s3549_s27 = smov %s2661_s28 }
 0x4db   : > { %s3550_s28 = smov %s3552_s9  ;;  %22 = sbr.rel (!%p20_p5) target bundleno = 6 (0x6), region = 93 }
 0x4e2   :  { %2111 = vsyncpa [#allocation3], 1 }
 0x4e3   :  { %2113 = vsyncpa [#allocation3 + $0x1], 1 }
 0x4e4   :  { %2114 = vsyncpa [#allocation4], 1 }
 0x4e5   :  { %2116 = vsyncpa [#allocation4 + $0x1], 1 }

</bundles_post_ra>
